<compile_context>
chip_gen: v7x
topology: tpu7x:2x2x1
jax: 0.10.0
libtpu: 0.0.40
codegen_flags: <defaults>
</compile_context>

<pallas_src>
import jax
import jax.numpy as jnp
from jax import lax
from jax.experimental import pallas as pl
from jax.experimental.pallas import tpu as pltpu


def _compute_dtype_and_precision(dtype):
    """Pick the matmul operand dtype / precision that keeps the gather exact."""
    if jnp.dtype(dtype) == jnp.dtype(jnp.bfloat16):
        # bf16 values pass through a single MXU pass exactly when multiplied by
        # an exact 0/1 selector -> no upcast, no multi-pass decomposition.
        return jnp.bfloat16, lax.Precision.DEFAULT
    # f32 (or other) data: upcast and use the exact multi-pass decomposition.
    return jnp.float32, lax.Precision.HIGHEST


def _make_gather_kernel(feat_cdtype, xyz_cdtype, feat_prec, xyz_prec):
    def kernel(inds_ref, xyz_ref, feat_ref, new_xyz_ref, new_feat_ref,
               xyz_acc, feat_acc):
        # inds_ref:     (1, 1, tn) int32
        # xyz_ref:      (1, D, tk)        feat_ref:     (1, C, tk)
        # new_xyz_ref:  (1, D, tn)        new_feat_ref: (1, C, tn)
        # xyz_acc:      (D, tn) f32       feat_acc:     (C, tn) f32
        k = pl.program_id(2)
        nk = pl.num_programs(2)
        tk = feat_ref.shape[2]
        tn = inds_ref.shape[2]

        @pl.when(k == 0)
        def _init():
            xyz_acc[...] = jnp.zeros_like(xyz_acc)
            feat_acc[...] = jnp.zeros_like(feat_acc)

        # One shared one-hot selector for this K-tile: sel[kk, i] = (k*tk + kk == idx[i]).
        idx = inds_ref[0]                                   # (1, tn) int32
        local = idx - k * tk
        sel_bool = lax.broadcasted_iota(jnp.int32, (tk, tn), 0) == local   # (tk, tn)

        sel_f = sel_bool.astype(feat_cdtype)
        feat_acc[...] += jnp.dot(
            feat_ref[0].astype(feat_cdtype), sel_f,
            precision=feat_prec, preferred_element_type=jnp.float32)       # (C, tn)

        if jnp.dtype(xyz_cdtype) == jnp.dtype(feat_cdtype):
            sel_x = sel_f
        else:
            sel_x = sel_bool.astype(xyz_cdtype)
        xyz_acc[...] += jnp.dot(
            xyz_ref[0].astype(xyz_cdtype), sel_x,
            precision=xyz_prec, preferred_element_type=jnp.float32)        # (D, tn)

        @pl.when(k == nk - 1)
        def _store():
            new_feat_ref[0] = feat_acc[...].astype(new_feat_ref.dtype)
            new_xyz_ref[0] = xyz_acc[...].astype(new_xyz_ref.dtype)

    return kernel


def _pick_sample_tile(M):
    """Lane-dense sample tile: 256 on wide-MXU chips when it divides M, else 128."""
    try:
        kind = jax.devices()[0].device_kind.lower()
    except Exception:  # pragma: no cover - defensive
        kind = ""
    wide_mxu = not any(v in kind for v in ("v2", "v3", "v4", "v5"))
    if wide_mxu and M % 256 == 0:
        return 256
    return 128


def _pick_k_tile(K):
    """Tile K to bound VMEM for large point clouds; whole-K slab when small."""
    if K <= 2048:
        return K
    for tk in (2048, 1024, 512, 256, 128):
        if K % tk == 0:
            return tk
    return K  # awkward K: fall back to the full slab


def _vmem_limit_bytes(C, D, tk, tn, feat_bytes, xyz_bytes):
    """Only raise the scoped-VMEM limit when the estimated footprint needs it."""
    est = 2 * (C * tk * feat_bytes + D * tk * xyz_bytes + tn * 4)   # double-buffered inputs
    est += 2 * (C * tn * feat_bytes + D * tn * xyz_bytes)           # output blocks
    est += (C + D) * tn * 4                                         # f32 accumulators
    est += tk * tn * 4                                              # selector
    est = int(est * 1.5) + (1 << 20)                                # slack
    if est <= 16 * 1024 * 1024:
        return None                                                 # default scoped limit is fine
    return min(max(est, 32 * 1024 * 1024), 64 * 1024 * 1024)        # stay under v7x physical


@jax.jit
def general_sampling(xyz, features, sample_inds):
    """Pallas forward of GeneralSamplingModule."""
    B, K, D = xyz.shape
    Bf, C, Kf = features.shape
    assert (B, K) == (Bf, Kf), (xyz.shape, features.shape)
    Bi, M = sample_inds.shape
    assert Bi == B, (sample_inds.shape, B)

    tn = _pick_sample_tile(M)
    tk = _pick_k_tile(K)

    # Pad M up to a lane-dense multiple of tn (unmasked vector stores); slice back below.
    Mp = ((M + tn - 1) // tn) * tn
    inds = sample_inds.astype(jnp.int32)
    if Mp != M:
        inds = jnp.pad(inds, ((0, 0), (0, Mp - M)))      # pad with index 0 (valid)
    inds_row = inds.reshape(B, 1, Mp)

    # (B, K, 3) -> (B, 3, K): keeps K on the lane axis in VMEM (only sublanes 3->8 pad).
    xyz_dk = jnp.transpose(xyz, (0, 2, 1))

    feat_cdtype, feat_prec = _compute_dtype_and_precision(features.dtype)
    xyz_cdtype, xyz_prec = _compute_dtype_and_precision(xyz.dtype)
    kernel = _make_gather_kernel(feat_cdtype, xyz_cdtype, feat_prec, xyz_prec)

    vmem_limit = _vmem_limit_bytes(C, D, tk, tn,
                                   jnp.dtype(features.dtype).itemsize,
                                   jnp.dtype(xyz.dtype).itemsize)

    grid = (B, Mp // tn, pl.cdiv(K, tk))

    new_xyz_dm, new_features = pl.pallas_call(
        kernel,
        out_shape=(
            jax.ShapeDtypeStruct((B, D, Mp), xyz.dtype),
            jax.ShapeDtypeStruct((B, C, Mp), features.dtype),
        ),
        grid=grid,
        in_specs=[
            pl.BlockSpec((1, 1, tn), lambda b, j, k: (b, 0, j)),   # sampled indices
            pl.BlockSpec((1, D, tk), lambda b, j, k: (b, 0, k)),   # xyz (D, K) slab tile
            pl.BlockSpec((1, C, tk), lambda b, j, k: (b, 0, k)),   # features (C, K) slab tile
        ],
        out_specs=(
            pl.BlockSpec((1, D, tn), lambda b, j, k: (b, 0, j)),   # new_xyz (lane-dense)
            pl.BlockSpec((1, C, tn), lambda b, j, k: (b, 0, j)),   # new_features (lane-dense)
        ),
        scratch_shapes=[
            pltpu.VMEM((D, tn), jnp.float32),
            pltpu.VMEM((C, tn), jnp.float32),
        ],
        compiler_params=pltpu.CompilerParams(
            dimension_semantics=("parallel", "parallel", "arbitrary"),
            vmem_limit_bytes=vmem_limit,
        ),
    )(inds_row, xyz_dk, features)

    # (B, 3, Mp) -> (B, M, 3); drop padded samples (tiny wrapper-side ops).
    new_xyz = jnp.transpose(new_xyz_dm, (0, 2, 1))[:, :M, :]
    new_features = new_features[:, :, :M]
    return new_xyz, new_features, sample_inds


if __name__ == "__main__":
    key = jax.random.PRNGKey(0)
    kxyz, kfeat, kidx = jax.random.split(key, 3)

    # Small shapes; M deliberately not a multiple of 128 to exercise the pad/slice path.
    B, K, C, M = 2, 256, 64, 120
    xyz = jax.random.normal(kxyz, (B, K, 3), jnp.float32)
    features = jax.random.normal(kfeat, (B, C, K), jnp.float32)
    sample_inds = jax.random.randint(kidx, (B, M), 0, K, dtype=jnp.int32)

    new_xyz, new_features, out_inds = general_sampling(xyz, features, sample_inds)
    new_xyz = jax.block_until_ready(new_xyz)
    new_features = jax.block_until_ready(new_features)

    # Pure-JAX reference of gather_operation semantics.
    batch = jnp.arange(B)[:, None]
    ref_xyz = xyz[batch, sample_inds]                                          # (B, M, 3)
    ref_feat = jnp.take_along_axis(features, sample_inds[:, None, :], axis=2)  # (B, C, M)

    assert new_xyz.shape == (B, M, 3), new_xyz.shape
    assert new_features.shape == (B, C, M), new_features.shape
    assert jnp.array_equal(out_inds, sample_inds), "sample_inds not passed through"
    assert jnp.allclose(new_xyz, ref_xyz, atol=1e-6, rtol=1e-6), "new_xyz mismatch"
    assert jnp.allclose(new_features, ref_feat, atol=1e-6, rtol=1e-6), "new_features mismatch"

    print("KERNEL_OK")
</pallas_src>

<mosaic_0001>
module attributes {stable_mosaic.version = 11 : i64} {
  func.func @kernel(%arg0: i32, %arg1: i32, %arg2: i32, %arg3: memref<1x1x128xi32, #tpu.memory_space<vmem>>, %arg4: memref<1x3x256xf32, #tpu.memory_space<vmem>>, %arg5: memref<1x64x256xf32, #tpu.memory_space<vmem>>, %arg6: memref<1x3x128xf32, #tpu.memory_space<vmem>>, %arg7: memref<1x64x128xf32, #tpu.memory_space<vmem>>, %arg8: memref<3x128xf32, #tpu.memory_space<vmem>>, %arg9: memref<64x128xf32, #tpu.memory_space<vmem>>) attributes {dimension_semantics = [#tpu.dimension_semantics<parallel>, #tpu.dimension_semantics<parallel>, #tpu.dimension_semantics<arbitrary>], iteration_bounds = array<i64: 2, 1, 1>, scalar_prefetch = 0 : i64, scratch_operands = 2 : i64, tpu.core_type = #tpu.core_type<tc>, window_params = [{transform_indices = @transform_0, window_bounds = array<i64: 1, 1, 128>}, {transform_indices = @transform_1, window_bounds = array<i64: 1, 3, 256>}, {transform_indices = @transform_2, window_bounds = array<i64: 1, 64, 256>}, {transform_indices = @transform_3, window_bounds = array<i64: 1, 3, 128>}, {transform_indices = @transform_4, window_bounds = array<i64: 1, 64, 128>}]} {
    %c0_i32 = arith.constant 0 : i32
    %0 = arith.cmpi eq, %arg2, %c0_i32 : i32
    %1 = arith.extui %0 : i1 to i32
    %c0_i32_0 = arith.constant 0 : i32
    %2 = arith.cmpi ne, %1, %c0_i32_0 : i32
    scf.if %2 {
      %cst_20 = arith.constant 0.000000e+00 : f32
      %28 = vector.broadcast %cst_20 : f32 to vector<3x128xf32>
      %c0_21 = arith.constant 0 : index
      %c0_22 = arith.constant 0 : index
      %29 = vector.load %arg8[%c0_21, %c0_22] : memref<3x128xf32, #tpu.memory_space<vmem>>, vector<3x128xf32>
      tpu.vector_store %arg8[%c0_21, %c0_22], %28 {strides = array<i32>} : memref<3x128xf32, #tpu.memory_space<vmem>>, vector<3x128xf32>,
      %cst_23 = arith.constant 0.000000e+00 : f32
      %30 = vector.broadcast %cst_23 : f32 to vector<64x128xf32>
      %c0_24 = arith.constant 0 : index
      %c0_25 = arith.constant 0 : index
      %31 = vector.load %arg9[%c0_24, %c0_25] : memref<64x128xf32, #tpu.memory_space<vmem>>, vector<64x128xf32>
      tpu.vector_store %arg9[%c0_24, %c0_25], %30 {strides = array<i32>} : memref<64x128xf32, #tpu.memory_space<vmem>>, vector<64x128xf32>,
    } else {
    }
    %c0 = arith.constant 0 : index
    %c0_1 = arith.constant 0 : index
    %c0_2 = arith.constant 0 : index
    %3 = vector.load %arg3[%c0, %c0_1, %c0_2] : memref<1x1x128xi32, #tpu.memory_space<vmem>>, vector<1x1x128xi32>
    %4 = vector.shape_cast %3 : vector<1x1x128xi32> to vector<1x128xi32>
    %c256_i32 = arith.constant 256 : i32
    %5 = arith.muli %arg2, %c256_i32 : i32
    %6 = vector.broadcast %5 : i32 to vector<1x128xi32>
    %7 = arith.subi %4, %6 : vector<1x128xi32>
    %8 = tpu.iota {dimensions = array<i32: 0>} : vector<256x128xi32>
    %9 = vector.broadcast %7 : vector<1x128xi32> to vector<256x128xi32>
    %10 = arith.cmpi eq, %8, %9 : vector<256x128xi32>
    %11 = arith.extui %10 : vector<256x128xi1> to vector<256x128xi32>
    %12 = arith.sitofp %11 : vector<256x128xi32> to vector<256x128xf32>
    %c0_3 = arith.constant 0 : index
    %c0_4 = arith.constant 0 : index
    %13 = vector.load %arg9[%c0_3, %c0_4] : memref<64x128xf32, #tpu.memory_space<vmem>>, vector<64x128xf32>
    %c0_5 = arith.constant 0 : index
    %c0_6 = arith.constant 0 : index
    %c0_7 = arith.constant 0 : index
    %14 = vector.load %arg5[%c0_5, %c0_6, %c0_7] : memref<1x64x256xf32, #tpu.memory_space<vmem>>, vector<1x64x256xf32>
    %15 = vector.shape_cast %14 : vector<1x64x256xf32> to vector<64x256xf32>
    %cst = arith.constant dense<0.000000e+00> : vector<64x128xf32>
    %16 = tpu.matmul %15, %12, %cst {dimension_numbers = #tpu.dot_dimension_numbers<[1], [0], [0], [1], [0, 0, 1, 1], [], []>, precision = #tpu.contract_precision<fp32>} : vector<64x256xf32>, vector<256x128xf32>, vector<64x128xf32> -> vector<64x128xf32>
    %17 = arith.addf %13, %16 : vector<64x128xf32>
    %c0_8 = arith.constant 0 : index
    %c0_9 = arith.constant 0 : index
    %18 = vector.load %arg9[%c0_8, %c0_9] : memref<64x128xf32, #tpu.memory_space<vmem>>, vector<64x128xf32>
    tpu.vector_store %arg9[%c0_8, %c0_9], %17 {strides = array<i32>} : memref<64x128xf32, #tpu.memory_space<vmem>>, vector<64x128xf32>,
    %c0_10 = arith.constant 0 : index
    %c0_11 = arith.constant 0 : index
    %19 = vector.load %arg8[%c0_10, %c0_11] : memref<3x128xf32, #tpu.memory_space<vmem>>, vector<3x128xf32>
    %c0_12 = arith.constant 0 : index
    %c0_13 = arith.constant 0 : index
    %c0_14 = arith.constant 0 : index
    %20 = vector.load %arg4[%c0_12, %c0_13, %c0_14] : memref<1x3x256xf32, #tpu.memory_space<vmem>>, vector<1x3x256xf32>
    %21 = vector.shape_cast %20 : vector<1x3x256xf32> to vector<3x256xf32>
    %cst_15 = arith.constant dense<0.000000e+00> : vector<3x128xf32>
    %22 = tpu.matmul %21, %12, %cst_15 {dimension_numbers = #tpu.dot_dimension_numbers<[1], [0], [0], [1], [0, 0, 1, 1], [], []>, precision = #tpu.contract_precision<fp32>} : vector<3x256xf32>, vector<256x128xf32>, vector<3x128xf32> -> vector<3x128xf32>
    %23 = arith.addf %19, %22 : vector<3x128xf32>
    %c0_16 = arith.constant 0 : index
    %c0_17 = arith.constant 0 : index
    %24 = vector.load %arg8[%c0_16, %c0_17] : memref<3x128xf32, #tpu.memory_space<vmem>>, vector<3x128xf32>
    tpu.vector_store %arg8[%c0_16, %c0_17], %23 {strides = array<i32>} : memref<3x128xf32, #tpu.memory_space<vmem>>, vector<3x128xf32>,
    %c0_i32_18 = arith.constant 0 : i32
    %25 = arith.cmpi eq, %arg2, %c0_i32_18 : i32
    %26 = arith.extui %25 : i1 to i32
    %c0_i32_19 = arith.constant 0 : i32
    %27 = arith.cmpi ne, %26, %c0_i32_19 : i32
    scf.if %27 {
      %c0_20 = arith.constant 0 : index
      %c0_21 = arith.constant 0 : index
      %28 = vector.load %arg9[%c0_20, %c0_21] : memref<64x128xf32, #tpu.memory_space<vmem>>, vector<64x128xf32>
      %c0_22 = arith.constant 0 : index
      %c0_23 = arith.constant 0 : index
      %c0_24 = arith.constant 0 : index
      %29 = vector.load %arg7[%c0_22, %c0_23, %c0_24] : memref<1x64x128xf32, #tpu.memory_space<vmem>>, vector<1x64x128xf32>
      %30 = vector.shape_cast %29 : vector<1x64x128xf32> to vector<64x128xf32>
      %31 = vector.shape_cast %28 : vector<64x128xf32> to vector<1x64x128xf32>
      tpu.vector_store %arg7[%c0_22, %c0_23, %c0_24], %31 {strides = array<i32>} : memref<1x64x128xf32, #tpu.memory_space<vmem>>, vector<1x64x128xf32>,
      %c0_25 = arith.constant 0 : index
      %c0_26 = arith.constant 0 : index
      %32 = vector.load %arg8[%c0_25, %c0_26] : memref<3x128xf32, #tpu.memory_space<vmem>>, vector<3x128xf32>
      %c0_27 = arith.constant 0 : index
      %c0_28 = arith.constant 0 : index
      %c0_29 = arith.constant 0 : index
      %33 = vector.load %arg6[%c0_27, %c0_28, %c0_29] : memref<1x3x128xf32, #tpu.memory_space<vmem>>, vector<1x3x128xf32>
      %34 = vector.shape_cast %33 : vector<1x3x128xf32> to vector<3x128xf32>
      %35 = vector.shape_cast %32 : vector<3x128xf32> to vector<1x3x128xf32>
      tpu.vector_store %arg6[%c0_27, %c0_28, %c0_29], %35 {strides = array<i32>} : memref<1x3x128xf32, #tpu.memory_space<vmem>>, vector<1x3x128xf32>,
    } else {
    }
    return
  }
  func.func @transform_0(%arg0: i32, %arg1: i32, %arg2: i32) -> (i32, i32, i32) {
    %c0_i32 = arith.constant 0 : i32
    %c0_i32_0 = arith.constant 0 : i32
    return %arg0, %c0_i32, %arg1 : i32, i32, i32
  }
  func.func @transform_1(%arg0: i32, %arg1: i32, %arg2: i32) -> (i32, i32, i32) {
    %c0_i32 = arith.constant 0 : i32
    %c0_i32_0 = arith.constant 0 : i32
    return %arg0, %c0_i32, %arg2 : i32, i32, i32
  }
  func.func @transform_2(%arg0: i32, %arg1: i32, %arg2: i32) -> (i32, i32, i32) {
    %c0_i32 = arith.constant 0 : i32
    %c0_i32_0 = arith.constant 0 : i32
    return %arg0, %c0_i32, %arg2 : i32, i32, i32
  }
  func.func @transform_3(%arg0: i32, %arg1: i32, %arg2: i32) -> (i32, i32, i32) {
    %c0_i32 = arith.constant 0 : i32
    %c0_i32_0 = arith.constant 0 : i32
    return %arg0, %c0_i32, %arg1 : i32, i32, i32
  }
  func.func @transform_4(%arg0: i32, %arg1: i32, %arg2: i32) -> (i32, i32, i32) {
    %c0_i32 = arith.constant 0 : i32
    %c0_i32_0 = arith.constant 0 : i32
    return %arg0, %c0_i32, %arg1 : i32, i32, i32
  }
}

</mosaic_0001>

<bundles_post_ra>
// kernel: general_sampling.1
= control target key start
LH: loop header
LB: loop body
LE: loop exit
PB: predicated region body
PF: predicated region fallthrough
CT: control target
= control target key end

     0   :  { %10 = vsyncpa [#allocation5], 0  ;;  %s5709_s0 = inlined_call_operand.vmem [shape: s32[2,1,128], index: 0, kind: input, shape index: {}]   ;;  %s5710_s1 = inlined_call_operand.vmem [shape: f32[2,3,256], index: 1, kind: input, shape index: {}]   ;;  %s5711_s2 = inlined_call_operand.hbm [shape: f32[2,64,256], index: 2, kind: input, shape index: {}]   ;;  %s5712_s3 = inlined_call_operand.vmem [shape: f32[2,3,128], index: 3, kind: output, shape index: {0}]   ;;  %s5713_s4 = inlined_call_operand.hbm [shape: f32[2,64,128], index: 4, kind: output, shape index: {1}]  }
   0x1   :  { %12 = vsyncpa [#allocation5 + $0x1], 0 }
   0x2   :  { %13 = vsyncpa [#allocation6], 0 }
   0x3   :  { %15 = vsyncpa [#allocation6 + $0x1], 0  ;;  %s4223_s15 = smov 0   ;;  %s4225_s16 = smov 0  }
   0x4   :  { %s4227_s17 = smov 0   ;;  %s4229_s18 = smov 0  }
   0x5   :  { %s4231_s19 = smov 0   ;;  %s4233_s20 = smov 0  }
   0x6 LB: > { %s2831_s21 = sadd.s32 4294967295, %s4188_s20   ;;  %s2832_s22 = sadd.s32 4294967294, %s4188_s20   ;;  %s4188_s20 = sphi %s4233_s20, %s21_s20   ;;  %s4184_s19 = sphi %s4231_s19, %s6091_s19   ;;  %s4180_s18 = sphi %s4229_s18, %s6090_s18   ;;  %s4176_s17 = sphi %s4227_s17, %s6089_s17   ;;  %s4172_s16 = sphi %s4225_s16, %s6088_s16   ;;  %s4168_s15 = sphi %s4223_s15, %s6087_s15  }
   0x7   : > { %s40_s23 = sadd.s32 1, %s4184_s19  ;;  %s105_s24 = sadd.s32 1, %s4176_s17 }
   0x8   : > { %p42_p0 = scmp.ge.s32.totalorder %s40_s23, 2  ;;  %p112_p1 = scmp.ne.s32.totalorder %s4176_s17, %s4172_s16 }
   0x9   : > { %p113_p2 = scmp.eq.s32.totalorder %s4188_s20, 0  ;;  %p118_p3 = scmp.ne.s32.totalorder %s4172_s16, %s4168_s15 }
   0xa   : > { %s6093_s23 = smov (%p42_p0, %s40_s23), 0  ;;  %p119_p5 = scmp.eq.s32.totalorder %s2831_s21, 0 }
   0xb   : > { %p4264_p4 = por %p113_p2, %p112_p1  ;;  %s100_s26 = ssub.s32 %s4184_s19, %s6093_s23 }
   0xc   : > { %p172_p6 = scmp.eq.s32.totalorder %s2831_s21, 1  ;;  %p103_p7 = scmp.eq.s32.totalorder %s100_s26, 0 }
   0xd   : > { %p4270_p8 = por %p119_p5, %p118_p3  ;;  %p178_p10 = scmp.eq.s32.totalorder %s2832_s22, 1 }
   0xe   : > { %p4274_p9 = por %p172_p6, %p112_p1  ;;  %p4019_p13 = scmp.lt.s32.totalorder %s4188_s20, 2 }
   0xf   : > { %s4279_s29 = scalar_select %p103_p7, %s4176_s17, %s105_s24  }
  0x10   : > { %s5856_s28 = scalar_select %p4274_p9, 1, 0 }
  0x11   : > { %p4281_p11 = por %p178_p10, %p118_p3  ;;  %s220_s5 = sand.u32 1, %s4176_s17  }
  0x12   : > { %s2835_s6 = sshll.u32 %s220_s5, 7  ;;  %s3074_s7 = sshll.u32 %s4184_s19, 11 }
  0x13   : > { %s5857_s30 = scalar_select %p4281_p11, 1, 0 }
  0x14   : > { %s4292_s10 = scalar_lea.hbm %s5711_s2, %s3074_s7  ;;  %s224_s11 = scalar_lea.vmem [#allocation4], %s2835_s6 }
  0x15   : > { %s233_s12 = sshll.u32 %s224_s11, 4  ;;  %p4298_p0 = pnand %p4019_p13, %p4264_p4  ;;  %s4294_s12 = int_to_ptr.vmem [resolvable:$true] %s233_s12 }
  0x16   : > { %s4303_s14 = scalar_lea.sflag [#allocation5], %s220_s5  ;;  %s4076_s21 = scalar_lea.hbm %s4292_s10, 2048 }
  0x17   : > { %p4077_p2 = scmp.ne.s32.totalorder %s4292_s10, %s4076_s21  ;;  %p4078_p3 = pneg %p4298_p0 }
  0x18   : > { %s4081_s25 = scalar_lea.hbm %s5711_s2, 4096  ;;  %p4082_p4 = scmp.lt.u32.totalorder %s4292_s10, %s5711_s2 }
  0x19   : > { %p4079_p5 = pnand %p4078_p3, %p4077_p2  ;;  %p4083_p7 = scmp.lt.u32.totalorder %s4081_s25, %s4076_s21 }
  0x1a   : > { %p4085_p13 = scmp.lt.u32.totalorder %s4076_s21, %s4292_s10 }
  0x1b   : > { %p4080_p6 = pneg %p4079_p5  ;;  %p4084_p10 = por %p4083_p7, %p4082_p4 }
  0x1d   : > { %p4086_p12 = por %p4085_p13, %p4084_p10 }
  0x1f   : > { %p4087_p1 = pnand %p4086_p12, %p4080_p6 }
  0x21   : > { %4090 = shalt.err (!%p4087_p1)
}
  0x22   : > { %s4091_s5 = scalar_lea.vmem %s4294_s12, 2048  ;;  %s4190_s7 = smov [#allocation4]  }
  0x23   : > { %p4092_p2 = scmp.ne.s32.totalorder %s4294_s12, %s4091_s5  ;;  %s4096_s8 = sshll.u32 %s4190_s7, 4  ;;  %s4097_s8 = int_to_ptr.vmem [resolvable:$false] %s4096_s8 }
  0x24   : > { %s4098_s9 = scalar_lea.vmem %s4097_s8, 4096  ;;  %p4099_p9 = scmp.lt.s32.totalorder %s4294_s12, %s4097_s8 }
  0x25   : > { %p4094_p5 = pnand %p4092_p2, %p4078_p3  ;;  %p4100_p4 = scmp.lt.s32.totalorder %s4098_s9, %s4091_s5 }
  0x27   : > { %p4095_p11 = pneg %p4094_p5  ;;  %p4101_p7 = por %p4100_p4, %p4099_p9 }
  0x29   : > { %p4102_p10 = pnand %p4101_p7, %p4095_p11 }
  0x2b   : > { %4105 = shalt.err (!%p4102_p10)
}
  0x2c   : > { %s4191_s11 = smov 256   ;;  %s4192_s21 = smov 16  }
  0x2d   : > { %4014 = dma.hbm_to_vmem [thread:$0]  (!%p4298_p0), %s4292_s10, 2048, %s4294_s12, %s4303_s14, %s4191_s11, %s4191_s11, %s4192_s21  }
  0x2e   : > { %p241_p12 = scmp.lt.s32.totalorder %s4188_s20, 3  ;;  %p5859_p1 = scmp.ge.s32.totalorder %s4188_s20, 1 }
  0x30   : > { %p242_p3 = pnand %p5859_p1, %p241_p12 }
  0x32   : > { %245 = sbr.rel (%p242_p3) target bundleno = 533 (0x215), region = 32 }
  0x39   : > { %s4335_s22 = sand.u32 1, %s4172_s16  }
  0x3a   : > { %s2839_s24 = sshll.u32 %s4335_s22, 7  ;;  %s248_s25 = scalar_lea.sflag [#allocation5], %s4335_s22 }
  0x3b   : > { %s4339_s26 = scalar_lea.vmem [#allocation4], %s2839_s24 }
  0x3c   : > { %4159 = dma.done.wait (%p4270_p8), %s248_s25, 2048  }
  0x3d   : > { %4161 = vsyncadd (%p4270_p8), %s248_s25, 4294965248  ;;  %p298_p9 = scmp.lt.s32.totalorder %s4180_s18, 1  ;;  %v339_v0 = vlaneseq  ;;  %v5736_v1 = vmov 0.0   ;;  %v5860_v20 = vmov 0  ;;  %v5734_v21 = vmov 1.0|1.0  }
  0x3e   : > { %326 = vst [vmem:[#allocation2] sm:$0x7] %v5736_v1  ;;  %v5863_v22 = vmov 0  ;;  %v5866_v27 = vmov 0  ;;  %s2840_s8 = sshll.u32 %s4335_s22, 6  ;;  %s3076_s21 = sshll.u32 %s4180_s18, 10 }
  0x3f   : > { %s4348_s10 = scalar_select %p298_p9, %s4180_s18, 1  ;;  %v4350_v2 = vshrl.u32 %v339_v0, 7 }
  0x40   : > { %s5639_s9 = scalar_lea.vmem [#allocation7], %s2840_s8  ;;  %s2664_s12 = scalar_lea.sflag [#allocation6], %s4335_s22 }
  0x41   : > { %s303_s14 = scalar_lea.vmem %s5709_s0, %s4348_s10  ;;  %v356_v3 = vadd.s32 128, %v4350_v2  ;;  %v357_v4 = vadd.s32 136, %v4350_v2  ;;  %v341_v5 = vadd.s32 8, %v4350_v2  ;;  %v358_v6 = vadd.s32 144, %v4350_v2  ;;  %s3075_s27 = sshll.u32 %s4348_s10, 3 }
  0x42   : > { %v359_v7 = vadd.s32 152, %v4350_v2  ;;  %v342_v8 = vadd.s32 16, %v4350_v2  ;;  %v343_v9 = vadd.s32 24, %v4350_v2  ;;  %v360_v10 = vadd.s32 160, %v4350_v2  ;;  %v4370_v15 = vld [vmem:[%s303_s14] ss:$0 sm:$0xff]  ;;  %s312_s7 = scalar_lea.vmem %s5710_s1, %s3075_s27 }
  0x43   : > { %v361_v11 = vadd.s32 168, %v4350_v2  ;;  %v344_v12 = vadd.s32 32, %v4350_v2  ;;  %v345_v13 = vadd.s32 40, %v4350_v2  ;;  %v4368_v14 = vadd.s32 176, %v4350_v2  ;;  %s2681_s11 = sshll.u32 %s5639_s9, 4  ;;  %p6084_p11 = scmp.ne.s32.totalorder %s5856_s28, 0  ;;  %s5649_s11 = int_to_ptr.vmem [resolvable:$true] %s2681_s11 }
  0x44   : > { %v4373_v16 = vadd.s32 184, %v4350_v2  ;;  %v4376_v17 = vadd.s32 48, %v4350_v2  ;;  %v4379_v18 = vadd.s32 56, %v4350_v2  ;;  %v4382_v19 = vadd.s32 192, %v4350_v2  ;;  %s4106_s18 = scalar_lea.vmem %s5649_s11, 1024  ;;  %s4195_s13 = smov [#allocation7]  }
  0x45   : > { %vm392_vm0 = vcmp.eq.s32.totalorder %v356_v3, %v4370_v15  ;;  %vm393_vm1 = vcmp.eq.s32.totalorder %v357_v4, %v4370_v15  ;;  %vm376_vm2 = vcmp.eq.s32.totalorder %v4350_v2, %v4370_v15  ;;  %vm377_vm3 = vcmp.eq.s32.totalorder %v341_v5, %v4370_v15  ;;  %p4107_p8 = scmp.ne.s32.totalorder %s5649_s11, %s4106_s18  ;;  %s4110_s14 = sshll.u32 %s4195_s13, 4  ;;  %s4111_s14 = int_to_ptr.vmem [resolvable:$false] %s4110_s14 }
  0x46   : > { %vm4393_vm4 = vmpackc.low %vm393_vm1, %vm392_vm0  ;;  %vm394_vm5 = vcmp.eq.s32.totalorder %v358_v6, %v4370_v15  ;;  %vm395_vm6 = vcmp.eq.s32.totalorder %v359_v7, %v4370_v15  ;;  %vm378_vm7 = vcmp.eq.s32.totalorder %v342_v8, %v4370_v15  ;;  %vm379_vm8 = vcmp.eq.s32.totalorder %v343_v9, %v4370_v15  ;;  %s4112_s27 = scalar_lea.vmem %s4111_s14, 2048  ;;  %p4113_p13 = scmp.lt.s32.totalorder %s5649_s11, %s4111_s14 }
  0x47   : > { %v5861_v20 = vsel %vm4393_vm4, 4294967295, %v5860_v20  ;;  %3624 = vmatprep.subr.msk.bf16.mxu0 %vm4393_vm4, %v5734_v21  ;;  %vm4409_vm9 = vmpackc.low %vm377_vm3, %vm376_vm2  ;;  %v2863_v23 = vsel %vm394_vm5, 1.0, %v5736_v1  ;;  %v2864_v24 = vsel %vm395_vm6, 1.0, %v5736_v1  ;;  %v2847_v25 = vsel %vm378_vm7, 1.0, %v5736_v1  ;;  %p4108_p0 = pnand %p4107_p8, %p6084_p11  ;;  %p4114_p2 = scmp.lt.s32.totalorder %s4112_s27, %s4106_s18 }
  0x48   : > { %5862 = vst [vmem:[#allocation10_spill] sm:$0xff] %v5861_v20  ;;  %v5864_v22 = vsel %vm4409_vm9, 4294967295, %v5863_v22  ;;  %v2848_v26 = vsel %vm379_vm8, 1.0, %v5736_v1  ;;  %3626 = vmatpush3.bf16.msk.msra.mxu0 %vm4409_vm9, %v5734_v21  ;;  %vm4424_vm10 = vmpackc.low %vm395_vm6, %vm394_vm5  ;;  %v4428_v28 = vsub.f32 %v2863_v23, %v2863_v23  ;;  %v4430_v29 = vsub.f32 %v2864_v24, %v2864_v24 }
  0x49   : > { %5865 = vst [vmem:[#allocation11_spill] sm:$0xff] %v5864_v22  ;;  %v5867_v27 = vsel %vm4424_vm10, 4294967295, %v5866_v27  ;;  %v4432_v30 = vsub.f32 %v2847_v25, %v2847_v25  ;;  %v4434_v31 = vsub.f32 %v2848_v26, %v2848_v26  ;;  %3628 = vmatprep.subr.msk.bf16.mxu0 %vm4424_vm10, %v5734_v21  ;;  %vm4443_vm11 = vmpackc.low %vm379_vm8, %vm378_vm7  ;;  %vm396_vm12 = vcmp.eq.s32.totalorder %v360_v10, %v4370_v15  ;;  %v494_v22 = vld [vmem:[%s4339_s26 + $0x70] sm:$0xff]  ;;  %p4109_p6 = pneg %p4108_p0  ;;  %p4115_p5 = por %p4114_p2, %p4113_p13 }
  0x4a   : > { %5868 = vst [vmem:[#allocation12_spill] sm:$0xff] %v5867_v27  ;;  %vm397_vm13 = vcmp.eq.s32.totalorder %v361_v11, %v4370_v15  ;;  %vm380_vm14 = vcmp.eq.s32.totalorder %v344_v12, %v4370_v15  ;;  %vm381_vm15 = vcmp.eq.s32.totalorder %v345_v13, %v4370_v15  ;;  %v2865_v33 = vsel %vm396_vm12, 1.0, %v5736_v1  ;;  %v495_v27 = vld [vmem:[%s4339_s26 + $0x78] sm:$0xff] }
  0x4b   : > { %v2866_v34 = vsel %vm397_vm13, 1.0, %v5736_v1  ;;  %vm4453_vm5 = vmpackc.low %vm397_vm13, %vm396_vm12  ;;  %v2849_v36 = vsel %vm380_vm14, 1.0, %v5736_v1  ;;  %v2850_v37 = vsel %vm381_vm15, 1.0, %v5736_v1  ;;  %v4463_v38 = vsub.f32 %v2865_v33, %v2865_v33  ;;  %p4116_p4 = pnand %p4115_p5, %p4109_p6 }
  0x4c   : > { %v4465_v39 = vsub.f32 %v2866_v34, %v2866_v34  ;;  %v4467_v40 = vsub.f32 %v2849_v36, %v2849_v36  ;;  %v4469_v41 = vsub.f32 %v2850_v37, %v2850_v37  ;;  %3630 = vmatpush3.bf16.msk.msra.mxu0 %vm4443_vm11, %v5734_v21  ;;  %v2861_v42 = vsel %vm392_vm0, 1.0, %v5736_v1  ;;  %vm4494_vm0 = vmpackc.low %vm381_vm15, %vm380_vm14 }
  0x4d   : > { %v2862_v43 = vsel %vm393_vm1, 1.0, %v5736_v1  ;;  %v2845_v44 = vsel %vm376_vm2, 1.0, %v5736_v1  ;;  %v2846_v45 = vsel %vm377_vm3, 1.0, %v5736_v1  ;;  %3632 = vmatprep.subr.msk.bf16.mxu0 %vm4453_vm5, %v5734_v21  ;;  %v4498_v47 = vsub.f32 %v2861_v42, %v2861_v42 }
  0x4e   : > { %v4500_v48 = vsub.f32 %v2862_v43, %v2862_v43  ;;  %v4502_v49 = vsub.f32 %v2845_v44, %v2845_v44  ;;  %v4504_v50 = vsub.f32 %v2846_v45, %v2846_v45  ;;  %vm398_vm1 = vcmp.eq.s32.totalorder %v4368_v14, %v4370_v15 }
  0x4f   : > { %5875 = vst [vmem:[#allocation13_spill] sm:$0xff] %v4498_v47  ;;  %vm399_vm2 = vcmp.eq.s32.totalorder %v4373_v16, %v4370_v15  ;;  %vm382_vm3 = vcmp.eq.s32.totalorder %v4376_v17, %v4370_v15  ;;  %vm383_vm6 = vcmp.eq.s32.totalorder %v4379_v18, %v4370_v15  ;;  %v5718_v51 = vand.u32 4294901760, %v4498_v47 }
  0x50   : > { %5876 = vst [vmem:[#allocation14_spill] sm:$0xff] %v4500_v48  ;;  %5877 = vst [vmem:[#allocation15_spill] sm:$0xff] %v4502_v49  ;;  %v5717_v52 = vand.u32 4294901760, %v4500_v48  ;;  %v5716_v53 = vand.u32 4294901760, %v4502_v49  ;;  %v5715_v54 = vand.u32 4294901760, %v4504_v50  ;;  %3634 = vmatpush3.bf16.msk.msra.mxu0 %vm4494_vm0, %v5734_v21  ;;  %v2867_v56 = vsel %vm398_vm1, 1.0, %v5736_v1 }
  0x51   : > { %5878 = vst [vmem:[#allocation16_spill] sm:$0xff] %v4504_v50  ;;  %vm4518_vm7 = vmpackc.low %vm399_vm2, %vm398_vm1  ;;  %v2868_v57 = vsel %vm399_vm2, 1.0, %v5736_v1  ;;  %v2851_v58 = vsel %vm382_vm3, 1.0, %v5736_v1  ;;  %v2852_v59 = vsel %vm383_vm6, 1.0, %v5736_v1  ;;  %v829_v60 = vsub.f32 %v4498_v47, %v5718_v51 }
  0x52   : > { %v836_v61 = vsub.f32 %v4500_v48, %v5717_v52  ;;  %v717_v62 = vsub.f32 %v4502_v49, %v5716_v53  ;;  %v724_v63 = vsub.f32 %v4504_v50, %v5715_v54  ;;  %3636 = vmatprep.subr.msk.bf16.mxu0 %vm4518_vm7, %v5734_v21  ;;  %vm4556_vm8 = vmpackc.low %vm383_vm6, %vm382_vm3  ;;  %v4560_v3 = vsub.f32 %v2867_v56, %v2867_v56 }
  0x53   : > { %v4562_v4 = vsub.f32 %v2868_v57, %v2868_v57  ;;  %v4564_v5 = vsub.f32 %v2851_v58, %v2851_v58  ;;  %v4566_v6 = vsub.f32 %v2852_v59, %v2852_v59  ;;  %v830_v7 = vand.u32 4294901760, %v829_v60 }
  0x54   : > { %v837_v8 = vand.u32 4294901760, %v836_v61  ;;  %v718_v9 = vand.u32 4294901760, %v717_v62  ;;  %v725_v10 = vand.u32 4294901760, %v724_v63  ;;  %3638 = vmatpush3.bf16.msk.msra.mxu0 %vm4556_vm8, %v5734_v21  ;;  %v5732_v11 = vand.u32 4294901760, %v4428_v28 }
  0x55   : > { %v5731_v12 = vand.u32 4294901760, %v4430_v29  ;;  %v5727_v13 = vand.u32 4294901760, %v4432_v30  ;;  %v5725_v14 = vand.u32 4294901760, %v4434_v31  ;;  %v365_v18 = vadd.s32 200, %v4350_v2 }
  0x56   : > { %v4575_v16 = vpack.c.bf16 %v837_v8, %v830_v7  ;;  %v4577_v17 = vpack.c.bf16 %v725_v10, %v718_v9  ;;  %vm400_vm12 = vcmp.eq.s32.totalorder %v4382_v19, %v4370_v15  ;;  %v843_v23 = vsub.f32 %v4428_v28, %v5732_v11 }
  0x57   : > { %v850_v24 = vsub.f32 %v4430_v29, %v5731_v12  ;;  %v731_v25 = vsub.f32 %v4432_v30, %v5727_v13  ;;  %v738_v26 = vsub.f32 %v4434_v31, %v5725_v14  ;;  %vm401_vm13 = vcmp.eq.s32.totalorder %v365_v18, %v4370_v15 }
  0x58   : > { %5883 = vst [vmem:[#allocation17_spill] sm:$0xff] %v4575_v16  ;;  %5884 = vst [vmem:[#allocation18_spill] sm:$0xff] %v4577_v17  ;;  %3656 = vmatprep.subr.bf16.mxu1 %v4575_v16  ;;  %v2869_v33 = vsel %vm400_vm12, 1.0, %v5736_v1  ;;  %v348_v34 = vadd.s32 64, %v4350_v2  ;;  %v349_v36 = vadd.s32 72, %v4350_v2  ;;  %v844_v37 = vand.u32 4294901760, %v843_v23 }
  0x59   : > { %3658 = vmatpush3.bf16.msra.mxu1 %v4577_v17  ;;  %v851_v42 = vand.u32 4294901760, %v850_v24  ;;  %v732_v43 = vand.u32 4294901760, %v731_v25  ;;  %v739_v44 = vand.u32 4294901760, %v738_v26  ;;  %vm4606_vm14 = vmpackc.low %vm401_vm13, %vm400_vm12  ;;  %v2870_v56 = vsel %vm401_vm13, 1.0, %v5736_v1 }
  0x5a   : > { %3640 = vmatprep.subr.msk.bf16.mxu0 %vm4606_vm14, %v5734_v21  ;;  %v4614_v57 = vsub.f32 %v2869_v33, %v2869_v33  ;;  %vm384_vm15 = vcmp.eq.s32.totalorder %v348_v34, %v4370_v15  ;;  %vm385_vm1 = vcmp.eq.s32.totalorder %v349_v36, %v4370_v15  ;;  %v4622_v19 = vsub.f32 %v2870_v56, %v2870_v56 }
  0x5b   : > { %v4618_v58 = vpack.c.bf16 %v851_v42, %v844_v37  ;;  %v4620_v59 = vpack.c.bf16 %v739_v44, %v732_v43  ;;  %v2853_v60 = vsel %vm384_vm15, 1.0, %v5736_v1  ;;  %vm4625_vm2 = vmpackc.low %vm385_vm1, %vm384_vm15  ;;  %v5889_v61 = vmov 0 }
  0x5c   : > { %v5890_v61 = vsel %vm4625_vm2, 4294967295, %v5889_v61  ;;  %v2854_v62 = vsel %vm385_vm1, 1.0, %v5736_v1  ;;  %3642 = vmatpush3.bf16.msk.msra.mxu0 %vm4625_vm2, %v5734_v21  ;;  %v4633_v63 = vsub.f32 %v2853_v60, %v2853_v60  ;;  %v5723_v7 = vand.u32 4294901760, %v4463_v38 }
  0x5d   : > { %5887 = vst [vmem:[#allocation19_spill] sm:$0xff] %v4618_v58  ;;  %5888 = vst [vmem:[#allocation20_spill] sm:$0xff] %v4620_v59  ;;  %v5722_v8 = vand.u32 4294901760, %v4465_v39  ;;  %3660 = vmatprep.subr.bf16.mxu1 %v4618_v58  ;;  %v4638_v9 = vsub.f32 %v2854_v62, %v2854_v62  ;;  %v5720_v10 = vand.u32 4294901760, %v4467_v40  ;;  %v5719_v18 = vand.u32 4294901760, %v4469_v41 }
  0x5e   : > { %5891 = vst [vmem:[#allocation21_spill] sm:$0xff] %v5890_v61  ;;  %v366_v23 = vadd.s32 208, %v4350_v2  ;;  %3662 = vmatpush3.bf16.msra.mxu1 %v4620_v59  ;;  %v857_v24 = vsub.f32 %v4463_v38, %v5723_v7  ;;  %v367_v26 = vadd.s32 216, %v4350_v2  ;;  %v350_v33 = vadd.s32 80, %v4350_v2  ;;  %v489_v61 = vld [vmem:[%s4339_s26 + $0x48] sm:$0xff] }
  0x5f   : > { %v864_v25 = vsub.f32 %v4465_v39, %v5722_v8  ;;  %v745_v34 = vsub.f32 %v4467_v40, %v5720_v10  ;;  %v752_v36 = vsub.f32 %v4469_v41, %v5719_v18  ;;  %v351_v37 = vadd.s32 88, %v4350_v2 }
  0x60   : > { %vm402_vm3 = vcmp.eq.s32.totalorder %v366_v23, %v4370_v15  ;;  %v858_v42 = vand.u32 4294901760, %v857_v24  ;;  %vm403_vm6 = vcmp.eq.s32.totalorder %v367_v26, %v4370_v15  ;;  %v5892_v54 = vmov 0 }
  0x61   : > { %v865_v43 = vand.u32 4294901760, %v864_v25  ;;  %v2871_v44 = vsel %vm402_vm3, 1.0, %v5736_v1  ;;  %v746_v56 = vand.u32 4294901760, %v745_v34  ;;  %v753_v60 = vand.u32 4294901760, %v752_v36  ;;  %vm4663_vm12 = vmpackc.low %vm403_vm6, %vm402_vm3 }
  0x62   : > { %v2872_v62 = vsel %vm403_vm6, 1.0, %v5736_v1  ;;  %v5893_v54 = vsel %vm4663_vm12, 4294967295, %v5892_v54  ;;  %v4667_v53 = vsub.f32 %v2871_v44, %v2871_v44  ;;  %3644 = vmatprep.subr.msk.bf16.mxu0 %vm4663_vm12, %v5734_v21  ;;  %vm386_vm13 = vcmp.eq.s32.totalorder %v350_v33, %v4370_v15 }
  0x63   : > { %5894 = vst [vmem:[#allocation22_spill] sm:$0xff] %v5893_v54  ;;  %v4669_v52 = vpack.c.bf16 %v865_v43, %v858_v42  ;;  %v4674_v23 = vsub.f32 %v2872_v62, %v2872_v62  ;;  %vm387_vm15 = vcmp.eq.s32.totalorder %v351_v37, %v4370_v15  ;;  %v4678_v24 = vpack.c.bf16 %v753_v60, %v746_v56 }
  0x64   : > { %v2855_v25 = vsel %vm386_vm13, 1.0, %v5736_v1  ;;  %v2856_v26 = vsel %vm387_vm15, 1.0, %v5736_v1  ;;  %vm4682_vm1 = vmpackc.low %vm387_vm15, %vm386_vm13  ;;  %v5897_v34 = vmov 0  ;;  %v5721_v36 = vand.u32 4294901760, %v4560_v3 }
  0x65   : > { %5895 = vst [vmem:[#allocation23_spill] sm:$0xff] %v4669_v52  ;;  %5896 = vst [vmem:[#allocation24_spill] sm:$0xff] %v4678_v24  ;;  %v5898_v34 = vsel %vm4682_vm1, 4294967295, %v5897_v34  ;;  %3664 = vmatprep.subr.bf16.mxu1 %v4669_v52  ;;  %3646 = vmatpush3.bf16.msk.msra.mxu0 %vm4682_vm1, %v5734_v21  ;;  %v4691_v33 = vsub.f32 %v2855_v25, %v2855_v25  ;;  %v4693_v37 = vsub.f32 %v2856_v26, %v2856_v26  ;;  %v5905_v12 = vmov 0 }
  0x66   : > { %5899 = vst [vmem:[#allocation25_spill] sm:$0xff] %v5898_v34  ;;  %v5724_v42 = vand.u32 4294901760, %v4562_v4  ;;  %v5726_v43 = vand.u32 4294901760, %v4564_v5  ;;  %3666 = vmatpush3.bf16.msra.mxu1 %v4678_v24  ;;  %v871_v44 = vsub.f32 %v4560_v3, %v5721_v36  ;;  %v5730_v56 = vand.u32 4294901760, %v4566_v6  ;;  %v484_v34 = vld [vmem:[%s4339_s26 + $0x20] sm:$0xff] }
  0x67   : > { %v368_v60 = vadd.s32 224, %v4350_v2  ;;  %v369_v62 = vadd.s32 232, %v4350_v2  ;;  %v352_v51 = vadd.s32 96, %v4350_v2  ;;  %v353_v18 = vadd.s32 104, %v4350_v2 }
  0x68   : > { %v878_v25 = vsub.f32 %v4562_v4, %v5724_v42  ;;  %v759_v26 = vsub.f32 %v4564_v5, %v5726_v43  ;;  %v872_v10 = vand.u32 4294901760, %v871_v44  ;;  %v766_v36 = vsub.f32 %v4566_v6, %v5730_v56 }
  0x69   : > { %vm404_vm3 = vcmp.eq.s32.totalorder %v368_v60, %v4370_v15  ;;  %vm405_vm6 = vcmp.eq.s32.totalorder %v369_v62, %v4370_v15  ;;  %v5900_v43 = vmov 0  ;;  %vm388_vm15 = vcmp.eq.s32.totalorder %v352_v51, %v4370_v15 }
  0x6a   : > { %v879_v8 = vand.u32 4294901760, %v878_v25  ;;  %v760_v7 = vand.u32 4294901760, %v759_v26  ;;  %v2873_v42 = vsel %vm404_vm3, 1.0, %v5736_v1  ;;  %v2874_v14 = vsel %vm405_vm6, 1.0, %v5736_v1  ;;  %vm4719_vm13 = vmpackc.low %vm405_vm6, %vm404_vm3 }
  0x6b   : > { %v5901_v43 = vsel %vm4719_vm13, 4294967295, %v5900_v43  ;;  %v767_v13 = vand.u32 4294901760, %v766_v36  ;;  %3648 = vmatprep.subr.msk.bf16.mxu0 %vm4719_vm13, %v5734_v21  ;;  %v4726_v44 = vsub.f32 %v2873_v42, %v2873_v42  ;;  %v4728_v60 = vsub.f32 %v2874_v14, %v2874_v14 }
  0x6c   : > { %5902 = vst [vmem:[#allocation26_spill] sm:$0xff] %v5901_v43  ;;  %v4731_v62 = vpack.c.bf16 %v879_v8, %v872_v10  ;;  %vm389_vm1 = vcmp.eq.s32.totalorder %v353_v18, %v4370_v15  ;;  %v2857_v25 = vsel %vm388_vm15, 1.0, %v5736_v1  ;;  %v5733_v26 = vand.u32 4294901760, %v4614_v57 }
  0x6d   : > { %v4736_v56 = vpack.c.bf16 %v767_v13, %v760_v7  ;;  %v2858_v36 = vsel %vm389_vm1, 1.0, %v5736_v1  ;;  %vm4739_vm3 = vmpackc.low %vm389_vm1, %vm388_vm15  ;;  %v4743_v14 = vsub.f32 %v2857_v25, %v2857_v25  ;;  %v5738_v51 = vand.u32 4294901760, %v4622_v19 }
  0x6e   : > { %5903 = vst [vmem:[#allocation27_spill] sm:$0xff] %v4731_v62  ;;  %v5906_v12 = vsel %vm4739_vm3, 4294967295, %v5905_v12  ;;  %3668 = vmatprep.subr.bf16.mxu1 %v4731_v62  ;;  %3650 = vmatpush3.bf16.msk.msra.mxu0 %vm4739_vm3, %v5734_v21  ;;  %v4750_v8 = vsub.f32 %v2858_v36, %v2858_v36  ;;  %v885_v13 = vsub.f32 %v4614_v57, %v5733_v26  ;;  %v5742_v7 = vand.u32 4294901760, %v4633_v63 }
  0x6f   : > { %5904 = vst [vmem:[#allocation28_spill] sm:$0xff] %v4736_v56  ;;  %5907 = vst [vmem:[#allocation29_spill] sm:$0xff] %v5906_v12  ;;  %v5746_v10 = vand.u32 4294901760, %v4638_v9  ;;  %3670 = vmatpush3.bf16.msra.mxu1 %v4736_v56  ;;  %v892_v18 = vsub.f32 %v4622_v19, %v5738_v51  ;;  %v370_v42 = vadd.s32 240, %v4350_v2  ;;  %v371_v25 = vadd.s32 248, %v4350_v2 }
  0x70   : > { %5908 = vst [vmem:[#allocation30_spill] sm:$0xff] %v4743_v14  ;;  %5909 = vst [vmem:[#allocation31_spill] sm:$0xff] %v4750_v8  ;;  %v354_v36 = vadd.s32 112, %v4350_v2  ;;  %v886_v11 = vand.u32 4294901760, %v885_v13  ;;  %v773_v26 = vsub.f32 %v4633_v63, %v5742_v7  ;;  %v355_v1 = vadd.s32 120, %v4350_v2 }
  0x71   : > { %v780_v21 = vsub.f32 %v4638_v9, %v5746_v10  ;;  %v893_v51 = vand.u32 4294901760, %v892_v18  ;;  %vm406_vm1 = vcmp.eq.s32.totalorder %v370_v42, %v4370_v15  ;;  %vm407_vm6 = vcmp.eq.s32.totalorder %v371_v25, %v4370_v15  ;;  %v481_v10 = vld [vmem:[%s4339_s26 + $0x8] sm:$0xff] }
  0x72   : > { %v774_v56 = vand.u32 4294901760, %v773_v26  ;;  %v5910_v62 = vmov 0.0   ;;  %vm4776_vm3 = vmpackc.low %vm407_vm6, %vm406_vm1  ;;  %v5911_v52 = vmov 0  ;;  %v5915_v18 = vmov 1.0|1.0  }
  0x73   : > { %v781_v13 = vand.u32 4294901760, %v780_v21  ;;  %v2875_v24 = vsel %vm406_vm1, 1.0, %v5910_v62  ;;  %v2876_v7 = vsel %vm407_vm6, 1.0, %v5910_v62  ;;  %v5912_v52 = vsel %vm4776_vm3, 4294967295, %v5911_v52  ;;  %3652 = vmatprep.subr.msk.bf16.mxu0 %vm4776_vm3, %v5915_v18  ;;  %v480_v21 = vld [vmem:[%s4339_s26] sm:$0xff] }
  0x74   : > { %5913 = vst [vmem:[#allocation32_spill] sm:$0xff] %v5912_v52  ;;  %v4781_v2 = vpack.c.bf16 %v893_v51, %v886_v11  ;;  %v4786_v42 = vsub.f32 %v2875_v24, %v2875_v24  ;;  %v4788_v25 = vsub.f32 %v2876_v7, %v2876_v7  ;;  %vm391_vm15 = vcmp.eq.s32.totalorder %v355_v1, %v4370_v15 }
  0x75   : > { %v4792_v26 = vpack.c.bf16 %v781_v13, %v774_v56  ;;  %vm5919_vm1 = vcmp.eq.s32.totalorder %v354_v36, %v4370_v15  ;;  %v2860_v11 = vsel %vm391_vm15, 1.0, %v5910_v62  ;;  %v5921_v51 = vmov 0  ;;  %v483_v36 = vld [vmem:[%s4339_s26 + $0x18] sm:$0xff] }
  0x76   : > { %5914 = vst [vmem:[#allocation33_spill] sm:$0xff] %v4781_v2  ;;  %5916 = vst [vmem:[#allocation34_spill] sm:$0xff] %v4786_v42  ;;  %v2859_v59 = vsel %vm5919_vm1, 1.0, %v5910_v62  ;;  %v5752_v24 = vand.u32 4294901760, %v4667_v53  ;;  %3672 = vmatprep.subr.bf16.mxu1 %v4781_v2  ;;  %v4811_v56 = vsub.f32 %v2860_v11, %v2860_v11  ;;  %v5755_v62 = vand.u32 4294901760, %v4674_v23 }
  0x77   : > { %5917 = vst [vmem:[#allocation35_spill] sm:$0xff] %v4788_v25  ;;  %5918 = vst [vmem:[#allocation36_spill] sm:$0xff] %v4792_v26  ;;  %v4809_v1 = vsub.f32 %v2859_v59, %v2859_v59  ;;  %v4814_v15 = vand.u32 4294901760, %v481_v10  ;;  %3674 = vmatpush3.bf16.msra.mxu1 %v4792_v26  ;;  %v4822_v2 = vand.u32 4294901760, %v480_v21  ;;  %v4832_v26 = vpack.c.bf16 %v4500_v48, %v4498_v47  ;;  %v490_v48 = vld [vmem:[%s4339_s26 + $0x50] sm:$0xff] }
  0x78   : > { %vm5920_vm6 = vmmov %vm5919_vm1  ;;  %v899_v7 = vsub.f32 %v4667_v53, %v5752_v24  ;;  %v906_v59 = vsub.f32 %v4674_v23, %v5755_v62  ;;  %v4836_v24 = vpack.c.bf16 %v4504_v50, %v4502_v49  ;;  %v5929_v58 = vand.u32 4294901760, %v4691_v33 }
  0x79   : > { %vm4800_vm13 = vmpackc.low %vm391_vm15, %vm5920_vm6  ;;  %5924 = vst [vmem:[#allocation38_spill] sm:$0xff] %v4814_v15  ;;  %v4828_v11 = vsub.f32 %v481_v10, %v4814_v15  ;;  %938 = vmatprep.mubr.f32.mxu1 %v4814_v15  ;;  %v5930_v62 = vand.u32 4294901760, %v4693_v37  ;;  %v4847_v16 = vsub.f32 %v480_v21, %v4822_v2  ;;  %v5770_v15 = vand.u32 4294901760, %v4726_v44 }
  0x7a   : > { %v5922_v51 = vsel %vm4800_vm13, 4294967295, %v5921_v51  ;;  %3654 = vmatpush3.bf16.msk.msra.mxu0 %vm4800_vm13, %v5915_v18  ;;  %5925 = vst [vmem:[#allocation39_spill] sm:$0xff] %v4822_v2  ;;  %5927 = vst [vmem:[#allocation41_spill] sm:$0xff] %v4832_v26  ;;  %v900_v13 = vand.u32 4294901760, %v899_v7  ;;  %v787_v17 = vsub.f32 %v4691_v33, %v5929_v58  ;;  %v5774_v7 = vand.u32 4294901760, %v4728_v60 }
  0x7b   : > { %5923 = vst [vmem:[#allocation37_spill] sm:$0xff] %v5922_v51  ;;  %5926 = vst [vmem:[#allocation40_spill] sm:$0xff] %v4828_v11  ;;  %v794_v10 = vsub.f32 %v4693_v37, %v5930_v62  ;;  %v907_v51 = vand.u32 4294901760, %v906_v59  ;;  %v5769_v52 = vand.u32 4294901760, %v4828_v11  ;;  %3688 = vmatprep.subr.bf16.mxu0 %v4832_v26  ;;  %v5775_v58 = vand.u32 4294901760, %v4847_v16 }
  0x7c   : > { %5928 = vst [vmem:[#allocation42_spill] sm:$0xff] %v4836_v24  ;;  %5931 = vst [vmem:[#allocation43_spill] sm:$0xff] %v4847_v16  ;;  %v788_v12 = vand.u32 4294901760, %v787_v17  ;;  %v4854_v50 = vand.u32 4294901760, %v483_v36  ;;  %v913_v62 = vsub.f32 %v4726_v44, %v5770_v15  ;;  %v920_v59 = vsub.f32 %v4728_v60, %v5774_v7  ;;  %v482_v17 = vld [vmem:[%s4339_s26 + $0x10] sm:$0xff] }
  0x7d   : > { %v795_v43 = vand.u32 4294901760, %v794_v10  ;;  %v4856_v49 = vpack.c.bf16 %v907_v51, %v900_v13  ;;  %v595_v21 = vsub.f32 %v4828_v11, %v5769_v52  ;;  %v601_v51 = vsub.f32 %v4847_v16, %v5775_v58  ;;  %v485_v16 = vld [vmem:[%s4339_s26 + $0x28] sm:$0xff] }
  0x7e   : > { %5932 = vst [vmem:[#allocation44_spill] sm:$0xff] %v4854_v50  ;;  %v4874_v13 = vsub.f32 %v483_v36, %v4854_v50  ;;  %v5780_v52 = vand.u32 4294901760, %v4743_v14  ;;  %v914_v26 = vand.u32 4294901760, %v913_v62  ;;  %v921_v11 = vand.u32 4294901760, %v920_v59 }
  0x7f   : > { %5933 = vst [vmem:[#allocation45_spill] sm:$0xff] %v4856_v49  ;;  %v4868_v10 = vpack.c.bf16 %v795_v43, %v788_v12  ;;  %3676 = vmatprep.subr.bf16.mxu1 %v4856_v49  ;;  %v596_v15 = vand.u32 4294901760, %v595_v21  ;;  %v5779_v7 = vand.u32 4294901760, %v4750_v8  ;;  %v602_v12 = vand.u32 4294901760, %v601_v51 }
  0x80   : > { %5935 = vst [vmem:[#allocation47_spill] sm:$0xff] %v4874_v13  ;;  %v5784_v43 = vand.u32 4294901760, %v4874_v13  ;;  %v801_v58 = vsub.f32 %v4743_v14, %v5780_v52  ;;  %v4884_v36 = vand.u32 4294901760, %v482_v17  ;;  %v4887_v49 = vpack.c.bf16 %v921_v11, %v914_v26 }
  0x81   : > { %5934 = vst [vmem:[#allocation46_spill] sm:$0xff] %v4868_v10  ;;  %3678 = vmatpush3.bf16.msra.mxu1 %v4868_v10  ;;  %597 = vmatprep.mubr.f32.mxu0 %v596_v15  ;;  %v808_v21 = vsub.f32 %v4750_v8, %v5779_v7  ;;  %v4894_v62 = vpack.c.bf16 %v4430_v29, %v4428_v28  ;;  %v5788_v11 = vand.u32 4294901760, %v4786_v42  ;;  %v5791_v52 = vand.u32 4294901760, %v4788_v25 }
  0x82   : > { %5936 = vst [vmem:[#allocation48_spill] sm:$0xff] %v4884_v36  ;;  %5937 = vst [vmem:[#allocation49_spill] sm:$0xff] %v4887_v49  ;;  %v4898_v59 = vpack.c.bf16 %v4434_v31, %v4432_v30  ;;  %603 = vmatmul.mubr.f32.vlgmr.msra.gmra.mrb[0].mxu0 %v602_v12  ;;  %v610_v15 = vsub.f32 %v4874_v13, %v5784_v43  ;;  %v802_v51 = vand.u32 4294901760, %v801_v58  ;;  %3680 = vmatprep.subr.bf16.mxu1 %v4887_v49 }
  0x83   : > { %5938 = vst [vmem:[#allocation50_spill] sm:$0xff] %v4894_v62  ;;  %v4904_v26 = vsub.f32 %v482_v17, %v4884_v36  ;;  %3690 = vmatpush3.bf16.msra.mxu0 %v4836_v24  ;;  %v809_v7 = vand.u32 4294901760, %v808_v21  ;;  %v4910_v10 = vand.u32 4294901760, %v485_v16  ;;  %v927_v43 = vsub.f32 %v4786_v42, %v5788_v11 }
  0x84   : > { %5939 = vst [vmem:[#allocation51_spill] sm:$0xff] %v4898_v59  ;;  %v611_v58 = vand.u32 4294901760, %v610_v15  ;;  %3692 = vmatprep.subr.bf16.mxu0 %v4894_v62  ;;  %v934_v12 = vsub.f32 %v4788_v25, %v5791_v52  ;;  %v5944_v15 = vand.u32 4294901760, %v4809_v1  ;;  %v4937_v13 = vand.u32 4294901760, %v484_v34  ;;  %v487_v52 = vld [vmem:[%s4339_s26 + $0x38] sm:$0xff] }
  0x85   : > { %5940 = vst [vmem:[#allocation52_spill] sm:$0xff] %v4904_v26  ;;  %5941 = vst [vmem:[#allocation53_spill] sm:$0xff] %v4910_v10  ;;  %v4920_v24 = vpack.c.bf16 %v809_v7, %v802_v51  ;;  %v4926_v49 = vsub.f32 %v485_v16, %v4910_v10  ;;  %v5945_v62 = vand.u32 4294901760, %v4904_v26  ;;  %v928_v21 = vand.u32 4294901760, %v927_v43  ;;  %v486_v16 = vld [vmem:[%s4339_s26 + $0x30] sm:$0xff] }
  0x86   : > { %v815_v17 = vsub.f32 %v4809_v1, %v5944_v15  ;;  %612 = vmatprep.mubr.f32.mxu0 %v611_v58  ;;  %v5946_v7 = vand.u32 4294901760, %v4811_v56  ;;  %5947 = vst [vmem:[#allocation56_spill] sm:$0xff] %v4937_v13  ;;  %v935_v58 = vand.u32 4294901760, %v934_v12  ;;  %v4946_v43 = vpack.c.bf16 %v4465_v39, %v4463_v38 }
  0x87   : > { %5942 = vst [vmem:[#allocation54_spill] sm:$0xff] %v4920_v24  ;;  %5943 = vst [vmem:[#allocation55_spill] sm:$0xff] %v4926_v49  ;;  %v616_v11 = vsub.f32 %v4904_v26, %v5945_v62  ;;  %3682 = vmatpush3.bf16.msra.mxu1 %v4920_v24  ;;  %3694 = vmatpush3.bf16.msra.mxu0 %v4898_v59  ;;  %v5801_v15 = vand.u32 4294901760, %v4926_v49  ;;  %v4949_v26 = vsub.f32 %v484_v34, %v4937_v13  ;;  %v488_v34 = vld [vmem:[%s4339_s26 + $0x40] sm:$0xff] }
  0x88   : > { %v822_v51 = vsub.f32 %v4811_v56, %v5946_v7  ;;  %v816_v54 = vand.u32 4294901760, %v815_v17  ;;  %5948 = vst [vmem:[#allocation57_spill] sm:$0xff] %v4946_v43  ;;  %v4953_v24 = vpack.c.bf16 %v4469_v41, %v4467_v40  ;;  %v4956_v59 = vpack.c.bf16 %v935_v58, %v928_v21  ;;  %3696 = vmatprep.subr.bf16.mxu0 %v4946_v43 }
  0x89   : > { %v617_v62 = vand.u32 4294901760, %v616_v11  ;;  %5949 = vst [vmem:[#allocation58_spill] sm:$0xff] %v4949_v26  ;;  %v625_v12 = vsub.f32 %v4926_v49, %v5801_v15  ;;  %v4962_v11 = vand.u32 4294901760, %v487_v52  ;;  %v4964_v17 = vand.u32 4294901760, %v486_v16  ;;  %v491_v15 = vld [vmem:[%s4339_s26 + $0x58] sm:$0xff] }
  0x8a   : > { %v823_v7 = vand.u32 4294901760, %v822_v51  ;;  %5950 = vst [vmem:[#allocation59_spill] sm:$0xff] %v4953_v24  ;;  %5951 = vst [vmem:[#allocation60_spill] sm:$0xff] %v4956_v59  ;;  %v4972_v21 = vpack.c.bf16 %v4562_v4, %v4560_v3  ;;  %v4976_v58 = vpack.c.bf16 %v4566_v6, %v4564_v5  ;;  %3684 = vmatprep.subr.bf16.mxu1 %v4956_v59  ;;  %v5957_v49 = vand.u32 4294901760, %v4949_v26 }
  0x8b   : > { %618 = vmatmul.mubr.f32.gmra.mrb[2].mxu0 %v617_v62  ;;  %v626_v43 = vand.u32 4294901760, %v625_v12  ;;  %v4985_v62 = vsub.f32 %v486_v16, %v4964_v17  ;;  %v4995_v12 = vand.u32 4294901760, %v488_v34 }
  0x8c   : > { %v4967_v51 = vpack.c.bf16 %v823_v7, %v816_v54  ;;  %5953 = vst [vmem:[#allocation62_spill] sm:$0xff] %v4972_v21  ;;  %5954 = vst [vmem:[#allocation63_spill] sm:$0xff] %v4976_v58  ;;  %3698 = vmatpush3.bf16.msra.mxu0 %v4953_v24  ;;  %v4982_v54 = vsub.f32 %v487_v52, %v4962_v11  ;;  %v4987_v7 = vand.u32 4294901760, %v489_v61 }
  0x8d   : > { %5956 = vst [vmem:[#allocation65_spill] sm:$0xff] %v4985_v62  ;;  %v631_v47 = vsub.f32 %v4949_v26, %v5957_v49  ;;  %3700 = vmatprep.subr.bf16.mxu0 %v4972_v21  ;;  %5958 = vst [vmem:[#allocation66_spill] sm:$0xff] %v4995_v12  ;;  %627 = vmatprep.mubr.f32.mxu0 %v626_v43  ;;  %v5817_v16 = vand.u32 4294901760, %v4985_v62  ;;  %v493_v49 = vld [vmem:[%s4339_s26 + $0x68] sm:$0xff]  ;;  %v5009_v21 = vsub.f32 %v488_v34, %v4995_v12  ;;  %v492_v12 = vld [vmem:[%s4339_s26 + $0x60] sm:$0xff]  ;;  %s5655_s26 = scalar_lea.hbm %s5713_s4, %s3076_s21 }
  0x8e   : > { %5952 = vst [vmem:[#allocation61_spill] sm:$0xff] %v4967_v51  ;;  %5955 = vst [vmem:[#allocation64_spill] sm:$0xff] %v4982_v54  ;;  %3686 = vmatpush3.bf16.msra.mxu1 %v4967_v51  ;;  %v5816_v52 = vand.u32 4294901760, %v4982_v54  ;;  %v5003_v24 = vsub.f32 %v489_v61, %v4987_v7  ;;  %v5005_v51 = vand.u32 4294901760, %v491_v15  ;;  %v5013_v43 = vpack.c.bf16 %v4622_v19, %v4614_v57 }
  0x8f   : > { %3720 = vmatprep.subr.msk.bf16.mxu1 %vm4393_vm4, %v5915_v18  ;;  %v632_v59 = vand.u32 4294901760, %v631_v47  ;;  %v5015_v26 = vand.u32 4294901760, %v490_v48  ;;  %v646_v20 = vsub.f32 %v4985_v62, %v5817_v16  ;;  %v5036_v16 = vpack.c.bf16 %v4638_v9, %v4633_v63 }
  0x90   : > { %5959 = vst [vmem:[#allocation67_spill] sm:$0xff] %v5003_v24  ;;  %5960 = vst [vmem:[#allocation68_spill] sm:$0xff] %v5013_v43  ;;  %v640_v61 = vsub.f32 %v4982_v54, %v5816_v52  ;;  %3702 = vmatpush3.bf16.msra.mxu0 %v4976_v58  ;;  %v5027_v34 = vsub.f32 %v491_v15, %v5005_v51  ;;  %v5041_v47 = vand.u32 4294901760, %v493_v49  ;;  %v5963_v54 = vand.u32 4294901760, %v5009_v21 }
  0x91   : > { %940 = vmatmul.mubr.f32.vlgmr.msra.gmra.mrb[0].mxu1 %v4822_v2  ;;  %633 = vmatmul.mubr.f32.gmra.mrb[4].mxu0 %v632_v59  ;;  %5961 = vst [vmem:[#allocation69_spill] sm:$0xff] %v5036_v16  ;;  %v5039_v58 = vsub.f32 %v490_v48, %v5015_v26  ;;  %v647_v2 = vand.u32 4294901760, %v646_v20  ;;  %v5962_v59 = vand.u32 4294901760, %v5003_v24 }
  0x92   : > { %3722 = vmatpush3.bf16.msk.msra.mxu1 %vm4409_vm9, %v5915_v18  ;;  %v641_v15 = vand.u32 4294901760, %v640_v61  ;;  %945 = vmatprep.mubr.f32.mxu1 %v4854_v50  ;;  %v5834_v62 = vand.u32 4294901760, %v5027_v34  ;;  %v661_v48 = vsub.f32 %v5009_v21, %v5963_v54  ;;  %v5057_v61 = vsub.f32 %v493_v49, %v5041_v47 }
  0x93   : > { %3724 = vmatprep.subr.msk.bf16.mxu1 %vm4424_vm10, %v5915_v18  ;;  %v655_v52 = vsub.f32 %v5003_v24, %v5962_v59  ;;  %3704 = vmatprep.subr.bf16.mxu0 %v5013_v43  ;;  %v5837_v20 = vand.u32 4294901760, %v5039_v58  ;;  %v5059_v50 = vand.u32 4294901760, %v492_v12  ;;  %v5069_v54 = vpack.c.bf16 %v4674_v23, %v4667_v53 }
  0x94   : > { %642 = vmatprep.mubr.f32.mxu0 %v641_v15  ;;  %v670_v24 = vsub.f32 %v5027_v34, %v5834_v62  ;;  %v662_v49 = vand.u32 4294901760, %v661_v48  ;;  %v5088_v48 = vand.u32 4294901760, %v494_v22  ;;  %3706 = vmatpush3.bf16.msra.mxu0 %v5036_v16 }
  0x95   : > { %947 = vmatmul.mubr.f32.gmra.mrb[2].mxu1 %v4884_v36  ;;  %v656_v59 = vand.u32 4294901760, %v655_v52  ;;  %5964 = vst [vmem:[#allocation70_spill] sm:$0xff] %v5069_v54  ;;  %648 = vmatmul.mubr.f32.gmra.mrb[6].mxu0 %v647_v2  ;;  %v676_v15 = vsub.f32 %v5039_v58, %v5837_v20  ;;  %v5841_v52 = vand.u32 4294901760, %v5057_v61  ;;  %v5079_v43 = vsub.f32 %v492_v12, %v5059_v50 }
  0x96   : > { %3726 = vmatpush3.bf16.msk.msra.mxu1 %vm4443_vm11, %v5915_v18  ;;  %952 = vmatprep.mubr.f32.mxu1 %v4910_v10  ;;  %v671_v62 = vand.u32 4294901760, %v670_v24  ;;  %v5084_v2 = vpack.c.bf16 %v4693_v37, %v4691_v33  ;;  %v5086_v36 = vand.u32 4294901760, %v495_v27  ;;  %v5104_v20 = vpack.c.bf16 %v4750_v8, %v4743_v14 }
  0x97   : > { %657 = vmatprep.mubr.f32.mxu0 %v656_v59  ;;  %3728 = vmatprep.subr.msk.bf16.mxu1 %vm4453_vm5, %v5915_v18  ;;  %v685_v12 = vsub.f32 %v5057_v61, %v5841_v52  ;;  %v5100_v59 = vpack.c.bf16 %v4728_v60, %v4726_v44  ;;  %v5112_v10 = vsub.f32 %v494_v22, %v5088_v48  ;;  %v677_v24 = vand.u32 4294901760, %v676_v15 }
  0x98   : > { %3708 = vmatprep.subr.bf16.mxu0 %v5069_v54  ;;  %v5109_v16 = vsub.f32 %v495_v27, %v5086_v36  ;;  %v5116_v52 = vpack.c.bf16 %v4788_v25, %v4786_v42  ;;  %v5966_v27 = vand.u32 4294901760, %v4428_v28  ;;  %v5967_v22 = vand.u32 4294901760, %v4430_v29 }
  0x99   : > { %954 = vmatmul.mubr.f32.gmra.mrb[4].mxu1 %v4937_v13  ;;  %663 = vmatmul.mubr.f32.gmra.mrb[8].mxu0 %v662_v49  ;;  %v686_v8 = vand.u32 4294901760, %v685_v12  ;;  %v5965_v13 = vand.u32 4294901760, %v5079_v43  ;;  %v5849_v25 = vand.u32 4294901760, %v5112_v10  ;;  %v5968_v15 = vand.u32 4294901760, %v4432_v30 }
  0x9a   : > { %3730 = vmatpush3.bf16.msk.msra.mxu1 %vm4494_vm0, %v5915_v18  ;;  %v5128_v14 = vpack.c.bf16 %v5967_v22, %v5966_v27  ;;  %672 = vmatprep.mubr.f32.mxu0 %v671_v62  ;;  %v5850_v49 = vand.u32 4294901760, %v5109_v16  ;;  %v5969_v12 = vand.u32 4294901760, %v4434_v31  ;;  %v5971_v28 = vand.u32 4294901760, %v4465_v39 }
  0x9b   : > { %v691_v54 = vsub.f32 %v5079_v43, %v5965_v13  ;;  %959 = vmatprep.mubr.f32.mxu1 %v4962_v11  ;;  %v5970_v13 = vand.u32 4294901760, %v4463_v38  ;;  %3710 = vmatpush3.bf16.msra.mxu0 %v5084_v2  ;;  %v5972_v62 = vand.u32 4294901760, %v4467_v40  ;;  %v5973_v30 = vand.u32 4294901760, %v4469_v41 }
  0x9c   : > { %v5137_v42 = vpack.c.bf16 %v5969_v12, %v5968_v15  ;;  %3732 = vmatprep.subr.msk.bf16.mxu1 %vm4518_vm7, %v5915_v18  ;;  %v5974_v31 = vand.u32 4294901760, %v4560_v3  ;;  %v5975_v38 = vand.u32 4294901760, %v4562_v4  ;;  %v5976_v39 = vand.u32 4294901760, %v4564_v5  ;;  %3712 = vmatprep.subr.bf16.mxu0 %v5100_v59 }
  0x9d   : > { %v5143_v29 = vpack.c.bf16 %v5971_v28, %v5970_v13  ;;  %v5153_v27 = vpack.c.bf16 %v5973_v30, %v5972_v62  ;;  %v5977_v15 = vand.u32 4294901760, %v4566_v6  ;;  %961 = vmatmul.mubr.f32.gmra.mrb[6].mxu1 %v4964_v17  ;;  %v700_v40 = vsub.f32 %v5109_v16, %v5850_v49  ;;  %678 = vmatmul.mubr.f32.gmra.mrb[10].mxu0 %v677_v24  ;;  %v6037_v49 = vld [vmem:[#allocation35_spill] sm:$0xff] }
  0x9e   : > { %v5159_v22 = vpack.c.bf16 %v5975_v38, %v5974_v31  ;;  %v706_v41 = vsub.f32 %v5112_v10, %v5849_v25  ;;  %v5978_v3 = vand.u32 4294901760, %v4614_v57  ;;  %v5979_v4 = vand.u32 4294901760, %v4622_v19  ;;  %3734 = vmatpush3.bf16.msk.msra.mxu1 %vm4556_vm8, %v5915_v18  ;;  %687 = vmatprep.mubr.f32.mxu0 %v686_v8  ;;  %v6025_v25 = vld [vmem:[#allocation67_spill] sm:$0xff] }
  0x9f   : > { %v5165_v12 = vpack.c.bf16 %v5977_v15, %v5976_v39  ;;  %v692_v6 = vand.u32 4294901760, %v691_v54  ;;  %v5980_v13 = vand.u32 4294901760, %v4633_v63  ;;  %v5981_v28 = vand.u32 4294901760, %v4638_v9  ;;  %966 = vmatprep.mubr.f32.mxu1 %v4987_v7  ;;  %3714 = vmatpush3.bf16.msra.mxu0 %v5104_v20 }
  0xa0   : > { %v5179_v5 = vpack.c.bf16 %v5979_v4, %v5978_v3  ;;  %v5983_v30 = vand.u32 4294901760, %v4667_v53  ;;  %v5984_v57 = vand.u32 4294901760, %v4674_v23  ;;  %v5986_v19 = vand.u32 4294901760, %v4691_v33  ;;  %3736 = vmatprep.subr.msk.bf16.mxu1 %vm4606_vm14, %v5915_v18  ;;  %v5991_v23 = vld [vmem:[#allocation66_spill] sm:$0xff]  ;;  %3716 = vmatprep.subr.bf16.mxu0 %v5116_v52  ;;  %v5992_v33 = vld [vmem:[#allocation13_spill] sm:$0xff] }
  0xa1   : > { %v5188_v62 = vpack.c.bf16 %v5981_v28, %v5980_v13  ;;  %v5987_v24 = vand.u32 4294901760, %v4693_v37  ;;  %v701_v63 = vand.u32 4294901760, %v700_v40  ;;  %v5989_v9 = vand.u32 4294901760, %v4726_v44  ;;  %968 = vmatmul.mubr.f32.gmra.mrb[8].mxu1 %v5991_v23  ;;  %v5994_v44 = vld [vmem:[#allocation14_spill] sm:$0xff]  ;;  %693 = vmatmul.mubr.f32.gmra.mrb[12].mxu0 %v692_v6  ;;  %v5998_v4 = vld [vmem:[#allocation25_spill] sm:$0xff]  ;;  %v6000_v6 = vld [vmem:[#allocation40_spill] sm:$0xff] }
  0xa2   : > { %v5194_v31 = vpack.c.bf16 %v5984_v57, %v5983_v30  ;;  %v5990_v54 = vand.u32 4294901760, %v4728_v60  ;;  %v5215_v53 = vpack.c.bf16 %v4811_v56, %v4809_v1  ;;  %v5993_v37 = vand.u32 4294901760, %v5992_v33  ;;  %3738 = vmatpush3.bf16.msk.msra.mxu1 %vm4625_vm2, %v5915_v18  ;;  %973 = vmatprep.mubr.f32.mxu1 %v5005_v51  ;;  %v6003_v28 = vld [vmem:[#allocation16_spill] sm:$0xff] }
  0xa3   : > { %5982 = vst [vmem:[#allocation71_spill] sm:$0xff] %v5188_v62  ;;  %v5200_v38 = vpack.c.bf16 %v5987_v24, %v5986_v19  ;;  %v5995_v60 = vand.u32 4294901760, %v5994_v44  ;;  %v707_v40 = vand.u32 4294901760, %v706_v41  ;;  %702 = vmatprep.mubr.f32.mxu0 %v701_v63  ;;  %3740 = vmatprep.subr.msk.bf16.mxu1 %vm4663_vm12, %v5915_v18  ;;  %vm5999_vm15 = vnez %v5998_v4  ;;  %v6001_v41 = vld [vmem:[#allocation15_spill] sm:$0xff]  ;;  %v6005_v19 = vld [vmem:[#allocation26_spill] sm:$0xff]  ;;  %v6008_v63 = vld [vmem:[#allocation29_spill] sm:$0xff] }
  0xa4   : > { %5985 = vst [vmem:[#allocation72_spill] sm:$0xff] %v5194_v31  ;;  %v5207_v39 = vpack.c.bf16 %v5990_v54, %v5989_v9  ;;  %3718 = vmatpush3.bf16.msra.mxu0 %v5215_v53  ;;  %v6002_v13 = vand.u32 4294901760, %v6001_v41  ;;  %v6004_v30 = vand.u32 4294901760, %v6003_v28  ;;  %vm6006_vm1 = vnez %v6005_v19  ;;  %v6007_v24 = vld [vmem:[#allocation43_spill] sm:$0xff]  ;;  %v6012_v33 = vld [vmem:[#allocation52_spill] sm:$0xff] }
  0xa5   : > { %5988 = vst [vmem:[#allocation73_spill] sm:$0xff] %v5200_v38  ;;  %v5223_v8 = vpack.c.bf16 %v5995_v60, %v5993_v37  ;;  %975 = vmatmul.mubr.f32.gmra.mrb[10].mxu1 %v5015_v26  ;;  %708 = vmatmul.mubr.f32.gmra.mrb[14].mxu0 %v707_v40  ;;  %vm6009_vm6 = vnez %v6008_v63  ;;  %v6010_v9 = vld [vmem:[#allocation47_spill] sm:$0xff]  ;;  %v6015_v60 = vand.u32 4294901760, %v6000_v6  ;;  %v6016_v40 = vand.u32 4294901760, %v6007_v24 }
  0xa6   : > { %3742 = vmatpush3.bf16.msk.msra.mxu1 %vm5999_vm15, %v5915_v18  ;;  %1124 = vmatprep.mubr.f32.mxu0 %v6000_v6  ;;  %v5244_v57 = vpack.c.bf16 %v6004_v30, %v6002_v13  ;;  %v6014_v44 = vld [vmem:[#allocation55_spill] sm:$0xff]  ;;  %v6018_v13 = vld [vmem:[#allocation58_spill] sm:$0xff]  ;;  %v6020_v30 = vld [vmem:[#allocation64_spill] sm:$0xff]  ;;  %v6021_v6 = vand.u32 4294901760, %v6010_v9 }
  0xa7   : > { %3752 = vmatprep.subr.bf16.mxu0 %v5223_v8  ;;  %980 = vmatprep.mubr.f32.mxu1 %v5041_v47 }
  0xa8   : > { %3744 = vmatprep.subr.msk.bf16.mxu1 %vm6006_vm1, %v5915_v18 }
  0xa9   : > { %982 = vmatmul.mubr.f32.gmra.mrb[12].mxu1 %v5059_v50  ;;  %1127 = vmatmul.mubr.f32.vlgmr.msra.gmra.mrb[16].mxu0 %v6007_v24  ;;  %v6022_v24 = vand.u32 4294901760, %v6012_v33 }
  0xaa   : > { %3746 = vmatpush3.bf16.msk.msra.mxu1 %vm6009_vm6, %v5915_v18  ;;  %3754 = vmatpush3.bf16.msra.mxu0 %v5244_v57 }
  0xab   : > { %1133 = vmatprep.mubr.f32.mxu0 %v6010_v9  ;;  %3756 = vmatprep.subr.bf16.mxu0 %v5128_v14  ;;  %v6026_v9 = vand.u32 4294901760, %v6014_v44  ;;  %v6082_v32 = vld [vmem:[#allocation72_spill] sm:$0xff] }
  0xac   : > { %987 = vmatprep.mubr.f32.mxu1 %v5086_v36  ;;  %3748 = vmatprep.subr.msk.bf16.mxu1 %vm4776_vm3, %v5915_v18  ;;  %v6083_v35 = vld [vmem:[#allocation73_spill] sm:$0xff] }
  0xad   : > { %989 = vmatmul.mubr.f32.gmra.mrb[14].mxu1 %v5088_v48  ;;  %1136 = vmatmul.mubr.f32.gmra.mrb[18].mxu0 %v6012_v33  ;;  %v6027_v33 = vand.u32 4294901760, %v6018_v13 }
  0xae   : > { %3750 = vmatpush3.bf16.msk.msra.mxu1 %vm4800_vm13, %v5915_v18  ;;  %3758 = vmatpush3.bf16.msra.mxu0 %v5137_v42 }
  0xaf   : > { %1142 = vmatprep.mubr.f32.mxu0 %v6014_v44  ;;  %3760 = vmatprep.subr.bf16.mxu0 %v5143_v29  ;;  %v6028_v44 = vand.u32 4294901760, %v6020_v30 }
  0xb0   : > { %1294 = vmatprep.mubr.f32.mxu1 %v6015_v60  ;;  %3784 = vmatprep.subr.msk.bf16.mxu1 %vm4393_vm4, %v5915_v18 }
  0xb1   : > { %1298 = vmatmul.mubr.f32.vlgmr.msra.gmra.mrb[16].mxu1 %v6016_v40  ;;  %1145 = vmatmul.mubr.f32.gmra.mrb[20].mxu0 %v6018_v13  ;;  %v6024_v40 = vld [vmem:[#allocation65_spill] sm:$0xff] }
  0xb2   : > { %3786 = vmatpush3.bf16.msk.msra.mxu1 %vm4409_vm9, %v5915_v18  ;;  %3762 = vmatpush3.bf16.msra.mxu0 %v5153_v27  ;;  %v6029_v13 = vand.u32 4294901760, %v6024_v40 }
  0xb3   : > { %1151 = vmatprep.mubr.f32.mxu0 %v6020_v30  ;;  %3764 = vmatprep.subr.bf16.mxu0 %v5159_v22 }
  0xb4   : > { %1305 = vmatprep.mubr.f32.mxu1 %v6021_v6  ;;  %3788 = vmatprep.subr.msk.bf16.mxu1 %vm4424_vm10, %v5915_v18  ;;  %v6030_v6 = vld [vmem:[#allocation30_spill] sm:$0xff] }
  0xb5   : > { %1309 = vmatmul.mubr.f32.gmra.mrb[18].mxu1 %v6022_v24  ;;  %1154 = vmatmul.mubr.f32.gmra.mrb[22].mxu0 %v6024_v40  ;;  %v6031_v30 = vand.u32 4294901760, %v6030_v6  ;;  %v6032_v24 = vld [vmem:[#allocation31_spill] sm:$0xff]  ;;  %v1767_v6 = vld [vmem:[%s312_s7] sm:$0x77] }
  0xb6   : > { %3790 = vmatpush3.bf16.msk.msra.mxu1 %vm4443_vm11, %v5915_v18  ;;  %3766 = vmatpush3.bf16.msra.mxu0 %v5165_v12 }
  0xb7   : > { %1160 = vmatprep.mubr.f32.mxu0 %v6025_v25  ;;  %3768 = vmatprep.subr.bf16.mxu0 %v5179_v5 }
  0xb8   : > { %1316 = vmatprep.mubr.f32.mxu1 %v6026_v9  ;;  %3792 = vmatprep.subr.msk.bf16.mxu1 %vm4453_vm5, %v5915_v18  ;;  %v6033_v9 = vand.u32 4294901760, %v6032_v24  ;;  %v6051_v24 = vld [vmem:[#allocation48_spill] sm:$0xff] }
  0xb9   : > { %1320 = vmatmul.mubr.f32.gmra.mrb[20].mxu1 %v6027_v33  ;;  %1163 = vmatmul.mubr.f32.gmra.mrb[24].mxu0 %v5009_v21  ;;  %v6034_v33 = vand.u32 4294901760, %v6025_v25  ;;  %v6040_v25 = vand.u32 4294901760, %v4809_v1  ;;  %v6044_v1 = vld [vmem:[#allocation38_spill] sm:$0xff] }
  0xba   : > { %3794 = vmatpush3.bf16.msk.msra.mxu1 %vm4494_vm0, %v5915_v18  ;;  %3770 = vmatpush3.bf16.msra.mxu0 %v5188_v62  ;;  %v5328_v40 = vpack.c.bf16 %v6033_v9, %v6031_v30  ;;  %v6050_v30 = vand.u32 4294901760, %v5112_v10  ;;  %v1769_v9 = vcombine.high %v1767_v6, %v1767_v6 }
  0xbb   : > { %1169 = vmatprep.mubr.f32.mxu0 %v5027_v34  ;;  %3772 = vmatprep.subr.bf16.mxu0 %v5194_v31  ;;  %v6038_v31 = vand.u32 4294901760, %v6037_v49  ;;  %v6041_v49 = vand.u32 4294901760, %v4811_v56  ;;  %v6045_v56 = vand.u32 4294901760, %v5057_v61 }
  0xbc   : > { %1327 = vmatprep.mubr.f32.mxu1 %v6028_v44  ;;  %3796 = vmatprep.subr.msk.bf16.mxu1 %vm4518_vm7, %v5915_v18  ;;  %v6035_v44 = vld [vmem:[#allocation34_spill] sm:$0xff] }
  0xbd   : > { %1331 = vmatmul.mubr.f32.gmra.mrb[22].mxu1 %v6029_v13  ;;  %1172 = vmatmul.mubr.f32.gmra.mrb[26].mxu0 %v5039_v58  ;;  %v6036_v13 = vand.u32 4294901760, %v6035_v44  ;;  %v6055_v44 = vld [vmem:[#allocation18_spill] sm:$0xff] }
  0xbe   : > { %3798 = vmatpush3.bf16.msk.msra.mxu1 %vm4556_vm8, %v5915_v18  ;;  %3774 = vmatpush3.bf16.msra.mxu0 %v5200_v38  ;;  %v6039_v38 = vand.u32 4294901760, %v5009_v21  ;;  %v5354_v21 = vpack.c.bf16 %v6041_v49, %v6040_v25  ;;  %v6056_v25 = vld [vmem:[#allocation19_spill] sm:$0xff]  ;;  %v6057_v49 = vld [vmem:[#allocation20_spill] sm:$0xff] }
  0xbf   : > { %1178 = vmatprep.mubr.f32.mxu0 %v5057_v61  ;;  %3776 = vmatprep.subr.bf16.mxu0 %v5207_v39  ;;  %v5337_v62 = vpack.c.bf16 %v6038_v31, %v6036_v13  ;;  %v6042_v31 = vand.u32 4294901760, %v5027_v34  ;;  %v6047_v34 = vld [vmem:[#allocation39_spill] sm:$0xff]  ;;  %v6049_v61 = vand.u32 4294901760, %v5109_v16  ;;  %v5422_v13 = vand.u32 4294901760, %v1769_v9 }
  0xc0   : > { %1338 = vmatprep.mubr.f32.mxu1 %v6034_v33  ;;  %3800 = vmatprep.subr.msk.bf16.mxu1 %vm4606_vm14, %v5915_v18  ;;  %v6054_v33 = vld [vmem:[#allocation56_spill] sm:$0xff] }
  0xc1   : > { %1342 = vmatmul.mubr.f32.gmra.mrb[24].mxu1 %v6039_v38  ;;  %1181 = vmatmul.mubr.f32.gmra.mrb[28].mxu0 %v5079_v43  ;;  %v6043_v38 = vand.u32 4294901760, %v5039_v58  ;;  %v6046_v58 = vand.u32 4294901760, %v5079_v43  ;;  %v6048_v43 = vld [vmem:[#allocation44_spill] sm:$0xff] }
  0xc2   : > { %3802 = vmatpush3.bf16.msk.msra.mxu1 %vm4625_vm2, %v5915_v18  ;;  %3778 = vmatpush3.bf16.msra.mxu0 %v5328_v40 }
  0xc3   : > { %1187 = vmatprep.mubr.f32.mxu0 %v5109_v16  ;;  %3780 = vmatprep.subr.bf16.mxu0 %v5337_v62  ;;  %v6052_v16 = vld [vmem:[#allocation53_spill] sm:$0xff] }
  0xc4   : > { %1349 = vmatprep.mubr.f32.mxu1 %v6042_v31  ;;  %3804 = vmatprep.subr.msk.bf16.mxu1 %vm4663_vm12, %v5915_v18  ;;  %v5432_v31 = vand.u32 4294901760, %v1767_v6 }
  0xc5   : > { %1353 = vmatmul.mubr.f32.gmra.mrb[26].mxu1 %v6043_v38  ;;  %1190 = vmatmul.mubr.f32.gmra.mrb[30].mxu0 %v5112_v10  ;;  %v6053_v10 = vld [vmem:[#allocation17_spill] sm:$0xff]  ;;  %v1868_v38 = vsub.f32 %v1769_v9, %v5422_v13 }
  0xc6   : > { %3806 = vmatpush3.bf16.msk.msra.mxu1 %vm5999_vm15, %v5915_v18  ;;  %3782 = vmatpush3.bf16.msra.mxu0 %v5354_v21 }
  0xc7   : > { %1541 = vmatprep.mubr.f32.mxu0 %v6044_v1  ;;  %3816 = vmatprep.subr.msk.bf16.mxu0 %vm4393_vm4, %v5915_v18 }
  0xc8   : > { %1360 = vmatprep.mubr.f32.mxu1 %v6045_v56  ;;  %3808 = vmatprep.subr.msk.bf16.mxu1 %vm6006_vm1, %v5915_v18  ;;  %v6059_v56 = vld [vmem:[#allocation24_spill] sm:$0xff] }
  0xc9   : > { %1364 = vmatmul.mubr.f32.gmra.mrb[28].mxu1 %v6046_v58  ;;  %1543 = vmatmul.mubr.f32.vlgmr.msra.gmra.mrb[32].mxu0 %v6047_v34  ;;  %v5448_v58 = vsub.f32 %v1767_v6, %v5432_v31 }
  0xca   : > { %3810 = vmatpush3.bf16.msk.msra.mxu1 %vm6009_vm6, %v5915_v18  ;;  %3818 = vmatpush3.bf16.msk.msra.mxu0 %vm4409_vm9, %v5915_v18 }
  0xcb   : > { %1548 = vmatprep.mubr.f32.mxu0 %v6048_v43  ;;  %3820 = vmatprep.subr.msk.bf16.mxu0 %vm4424_vm10, %v5915_v18  ;;  %v1875_v6 = vand.u32 4294901760, %v5448_v58 }
  0xcc   : > { %1371 = vmatprep.mubr.f32.mxu1 %v6049_v61  ;;  %3812 = vmatprep.subr.msk.bf16.mxu1 %vm4776_vm3, %v5915_v18  ;;  %v6061_v61 = vld [vmem:[#allocation28_spill] sm:$0xff] }
  0xcd   : > { %1375 = vmatmul.mubr.f32.gmra.mrb[30].mxu1 %v6050_v30  ;;  %1550 = vmatmul.mubr.f32.gmra.mrb[34].mxu0 %v6051_v24 }
  0xce   : > { %3814 = vmatpush3.bf16.msk.msra.mxu1 %vm4800_vm13, %v5915_v18  ;;  %3822 = vmatpush3.bf16.msk.msra.mxu0 %vm4443_vm11, %v5915_v18 }
  0xcf   : > { %1555 = vmatprep.mubr.f32.mxu0 %v6052_v16  ;;  %3824 = vmatprep.subr.msk.bf16.mxu0 %vm4453_vm5, %v5915_v18 }
  0xd0   : > { %1694 = vmatprep.mubr.f32.mxu1 %v6044_v1  ;;  %3848 = vmatprep.subr.bf16.mxu1 %v6053_v10  ;;  %v6058_v1 = vld [vmem:[#allocation23_spill] sm:$0xff]  ;;  %v6066_v10 = vld [vmem:[#allocation41_spill] sm:$0xff] }
  0xd1   : > { %1696 = vmatmul.mubr.f32.vlgmr.msra.gmra.mrb[32].mxu1 %v6047_v34  ;;  %1557 = vmatmul.mubr.f32.gmra.mrb[36].mxu0 %v6054_v33  ;;  %v1869_v34 = vand.u32 4294901760, %v1868_v38 }
  0xd2   : > { %3850 = vmatpush3.bf16.msra.mxu1 %v6055_v44  ;;  %3826 = vmatpush3.bf16.msk.msra.mxu0 %vm4494_vm0, %v5915_v18  ;;  %v6070_v44 = vld [vmem:[#allocation50_spill] sm:$0xff] }
  0xd3   : > { %1562 = vmatprep.mubr.f32.mxu0 %v4962_v11  ;;  %3828 = vmatprep.subr.msk.bf16.mxu0 %vm4518_vm7, %v5915_v18  ;;  %v1870_v30 = vsub.f32 %v1868_v38, %v1869_v34 }
  0xd4   : > { %1701 = vmatprep.mubr.f32.mxu1 %v6048_v43  ;;  %3852 = vmatprep.subr.bf16.mxu1 %v6056_v25  ;;  %v6060_v43 = vld [vmem:[#allocation27_spill] sm:$0xff]  ;;  %v6071_v25 = vld [vmem:[#allocation60_spill] sm:$0xff] }
  0xd5   : > { %1703 = vmatmul.mubr.f32.gmra.mrb[34].mxu1 %v6051_v24  ;;  %1564 = vmatmul.mubr.f32.gmra.mrb[38].mxu0 %v4964_v17  ;;  %v1876_v24 = vsub.f32 %v5448_v58, %v1875_v6 }
  0xd6   : > { %3854 = vmatpush3.bf16.msra.mxu1 %v6057_v49  ;;  %3830 = vmatpush3.bf16.msk.msra.mxu0 %vm4556_vm8, %v5915_v18  ;;  %v6072_v49 = vld [vmem:[#allocation61_spill] sm:$0xff] }
  0xd7   : > { %1569 = vmatprep.mubr.f32.mxu0 %v4987_v7  ;;  %3832 = vmatprep.subr.msk.bf16.mxu0 %vm4606_vm14, %v5915_v18  ;;  %v1877_v9 = vand.u32 4294901760, %v1876_v24 }
  0xd8   : > { %1708 = vmatprep.mubr.f32.mxu1 %v6052_v16  ;;  %3856 = vmatprep.subr.bf16.mxu1 %v6058_v1  ;;  %v1871_v16 = vand.u32 4294901760, %v1870_v30  ;;  %v6078_v1 = vld [vmem:[#allocation68_spill] sm:$0xff] }
  0xd9   : > { %1710 = vmatmul.mubr.f32.gmra.mrb[36].mxu1 %v6054_v33  ;;  %1571 = vmatmul.mubr.f32.gmra.mrb[40].mxu0 %v5991_v23  ;;  %v6069_v33 = vld [vmem:[#allocation42_spill] sm:$0xff] }
  0xda   : > { %3858 = vmatpush3.bf16.msra.mxu1 %v6059_v56  ;;  %3834 = vmatpush3.bf16.msk.msra.mxu0 %vm4625_vm2, %v5915_v18  ;;  %v6079_v56 = vld [vmem:[#allocation69_spill] sm:$0xff] }
  0xdb   : > { %1576 = vmatprep.mubr.f32.mxu0 %v5005_v51  ;;  %3836 = vmatprep.subr.msk.bf16.mxu0 %vm4663_vm12, %v5915_v18 }
  0xdc   : > { %1715 = vmatprep.mubr.f32.mxu1 %v4962_v11  ;;  %3860 = vmatprep.subr.bf16.mxu1 %v6060_v43  ;;  %v6062_v11 = vld [vmem:[#allocation33_spill] sm:$0xff] }
  0xdd   : > { %1717 = vmatmul.mubr.f32.gmra.mrb[38].mxu1 %v4964_v17  ;;  %1578 = vmatmul.mubr.f32.gmra.mrb[42].mxu0 %v5015_v26  ;;  %v6063_v17 = vld [vmem:[#allocation36_spill] sm:$0xff] }
  0xde   : > { %3862 = vmatpush3.bf16.msra.mxu1 %v6061_v61  ;;  %3838 = vmatpush3.bf16.msk.msra.mxu0 %vm5999_vm15, %v5915_v18 }
  0xdf   : > { %1583 = vmatprep.mubr.f32.mxu0 %v5041_v47  ;;  %3840 = vmatprep.subr.msk.bf16.mxu0 %vm6006_vm1, %v5915_v18 }
  0xe0   : > { %1722 = vmatprep.mubr.f32.mxu1 %v4987_v7  ;;  %3864 = vmatprep.subr.bf16.mxu1 %v6062_v11  ;;  %v6064_v7 = vld [vmem:[#allocation45_spill] sm:$0xff] }
  0xe1   : > { %1724 = vmatmul.mubr.f32.gmra.mrb[40].mxu1 %v5991_v23  ;;  %1585 = vmatmul.mubr.f32.gmra.mrb[44].mxu0 %v5059_v50  ;;  %v6065_v23 = vld [vmem:[#allocation46_spill] sm:$0xff] }
  0xe2   : > { %3866 = vmatpush3.bf16.msra.mxu1 %v6063_v17  ;;  %3842 = vmatpush3.bf16.msk.msra.mxu0 %vm6009_vm6, %v5915_v18 }
  0xe3   : > { %1590 = vmatprep.mubr.f32.mxu0 %v5086_v36  ;;  %3844 = vmatprep.subr.msk.bf16.mxu0 %vm4776_vm3, %v5915_v18 }
  0xe4   : > { %1729 = vmatprep.mubr.f32.mxu1 %v5005_v51  ;;  %3868 = vmatprep.subr.bf16.mxu1 %v6064_v7  ;;  %v6067_v51 = vld [vmem:[#allocation49_spill] sm:$0xff] }
  0xe5   : > { %1731 = vmatmul.mubr.f32.gmra.mrb[42].mxu1 %v5015_v26  ;;  %1592 = vmatmul.mubr.f32.gmra.mrb[46].mxu0 %v5088_v48  ;;  %v6068_v26 = vld [vmem:[#allocation54_spill] sm:$0xff] }
  0xe6   : > { %3870 = vmatpush3.bf16.msra.mxu1 %v6065_v23  ;;  %3846 = vmatpush3.bf16.msk.msra.mxu0 %vm4800_vm13, %v5915_v18 }
  0xe7   : > { %1872 = vmatprep.mubr.f32.mxu0 %v1871_v16  ;;  %3880 = vmatprep.subr.bf16.mxu0 %v6066_v10 }
  0xe8   : > { %1736 = vmatprep.mubr.f32.mxu1 %v5041_v47  ;;  %3872 = vmatprep.subr.bf16.mxu1 %v6067_v51  ;;  %v6074_v47 = vld [vmem:[#allocation57_spill] sm:$0xff] }
  0xe9   : > { %1738 = vmatmul.mubr.f32.gmra.mrb[44].mxu1 %v5059_v50  ;;  %1878 = vmatmul.mubr.f32.vlgmr.msra.gmra.mrb[48].mxu0 %v1877_v9  ;;  %v6073_v50 = vld [vmem:[#allocation51_spill] sm:$0xff] }
  0xea   : > { %3874 = vmatpush3.bf16.msra.mxu1 %v6068_v26  ;;  %3882 = vmatpush3.bf16.msra.mxu0 %v6069_v33 }
  0xeb   : > { %1743 = vmatprep.mubr.f32.mxu1 %v5086_v36  ;;  %3884 = vmatprep.subr.bf16.mxu0 %v6070_v44  ;;  %v6075_v36 = vld [vmem:[#allocation59_spill] sm:$0xff] }
  0xec   : > { %3876 = vmatprep.subr.bf16.mxu1 %v6071_v25  ;;  %2245 = vmatprep.mubr.f32.mxu0 %v1868_v38  ;;  %v6077_v38 = vld [vmem:[#allocation63_spill] sm:$0xff] }
  0xed   : > { %1745 = vmatmul.mubr.f32.gmra.mrb[46].mxu1 %v5088_v48  ;;  %v6076_v48 = vld [vmem:[#allocation62_spill] sm:$0xff] }
  0xee   : > { %3878 = vmatpush3.bf16.msra.mxu1 %v6072_v49  ;;  %2108 = vmatprep.mubr.f32.mxu1 %v5422_v13 }
  0xef   : > { %3886 = vmatpush3.bf16.msra.mxu0 %v6073_v50  ;;  %3912 = vmatprep.subr.msk.bf16.mxu1 %vm4393_vm4, %v5915_v18 }
  0xf0   : > { %3888 = vmatprep.subr.bf16.mxu0 %v6074_v47 }
  0xf1   : > { %2110 = vmatmul.mubr.f32.vlgmr.msra.gmra.mrb[48].mxu1 %v5432_v31 }
  0xf2   : > { %3914 = vmatpush3.bf16.msk.msra.mxu1 %vm4409_vm9, %v5915_v18  ;;  %2352 = vmatprep.mubr.f32.mxu1 %v1869_v34  ;;  %v6080_v34 = vld [vmem:[#allocation70_spill] sm:$0xff] }
  0xf3   : > { %3890 = vmatpush3.bf16.msra.mxu0 %v6075_v36  ;;  %3916 = vmatprep.subr.msk.bf16.mxu1 %vm4424_vm10, %v5915_v18 }
  0xf4   : > { %3892 = vmatprep.subr.bf16.mxu0 %v6076_v48 }
  0xf6   : > { %3918 = vmatpush3.bf16.msk.msra.mxu1 %vm4443_vm11, %v5915_v18 }
  0xf7   : > { %3894 = vmatpush3.bf16.msra.mxu0 %v6077_v38  ;;  %3920 = vmatprep.subr.msk.bf16.mxu1 %vm4453_vm5, %v5915_v18 }
  0xf8   : > { %3896 = vmatprep.subr.bf16.mxu0 %v6078_v1 }
  0xfa   : > { %3922 = vmatpush3.bf16.msk.msra.mxu1 %vm4494_vm0, %v5915_v18 }
  0xfb   : > { %3898 = vmatpush3.bf16.msra.mxu0 %v6079_v56  ;;  %3924 = vmatprep.subr.msk.bf16.mxu1 %vm4518_vm7, %v5915_v18 }
  0xfc   : > { %3900 = vmatprep.subr.bf16.mxu0 %v6080_v34 }
  0xfe   : > { %3926 = vmatpush3.bf16.msk.msra.mxu1 %vm4556_vm8, %v5915_v18 }
  0xff   : > { %3902 = vmatpush3.bf16.msra.mxu0 %v5084_v2  ;;  %3928 = vmatprep.subr.msk.bf16.mxu1 %vm4606_vm14, %v5915_v18 }
 0x100   : > { %3904 = vmatprep.subr.bf16.mxu0 %v5100_v59 }
 0x102   : > { %3930 = vmatpush3.bf16.msk.msra.mxu1 %vm4625_vm2, %v5915_v18 }
 0x103   : > { %3906 = vmatpush3.bf16.msra.mxu0 %v5104_v20  ;;  %3932 = vmatprep.subr.msk.bf16.mxu1 %vm4663_vm12, %v5915_v18 }
 0x104   : > { %3908 = vmatprep.subr.bf16.mxu0 %v5116_v52 }
 0x106   : > { %3934 = vmatpush3.bf16.msk.msra.mxu1 %vm5999_vm15, %v5915_v18 }
 0x107   : > { %3910 = vmatpush3.bf16.msra.mxu0 %v5215_v53  ;;  %3936 = vmatprep.subr.msk.bf16.mxu1 %vm6006_vm1, %v5915_v18 }
 0x108   : > { %3944 = vmatprep.subr.bf16.mxu0 %v5223_v8 }
 0x10a   : > { %2248 = vmatmul.mubr.f32.vlgmr.msra.gmra.mrb[50].mxu0 %v5448_v58  ;;  %3938 = vmatpush3.bf16.msk.msra.mxu1 %vm6009_vm6, %v5915_v18 }
 0x10b   : > { %3946 = vmatpush3.bf16.msra.mxu0 %v5244_v57  ;;  %3940 = vmatprep.subr.msk.bf16.mxu1 %vm4776_vm3, %v5915_v18 }
 0x10c   : > { %3948 = vmatprep.subr.bf16.mxu0 %v5128_v14  ;;  %2522 = vmatprep.mubr.f32.mxu0 %v5422_v13  ;;  %v6081_v14 = vld [vmem:[#allocation71_spill] sm:$0xff] }
 0x10e   : > { %3942 = vmatpush3.bf16.msk.msra.mxu1 %vm4800_vm13, %v5915_v18 }
 0x10f   : > { %3950 = vmatpush3.bf16.msra.mxu0 %v5137_v42  ;;  %3976 = vmatprep.subr.msk.bf16.mxu1 %vm4393_vm4, %v5915_v18 }
 0x110   : > { %3952 = vmatprep.subr.bf16.mxu0 %v5143_v29 }
 0x111   : > { %2356 = vmatmul.mubr.f32.vlgmr.msra.gmra.mrb[50].mxu1 %v1875_v6 }
 0x112   : > { %3978 = vmatpush3.bf16.msk.msra.mxu1 %vm4409_vm9, %v5915_v18  ;;  %2626 = vmatprep.mubr.f32.mxu1 %v5422_v13 }
 0x113   : > { %3954 = vmatpush3.bf16.msra.mxu0 %v5153_v27  ;;  %3980 = vmatprep.subr.msk.bf16.mxu1 %vm4424_vm10, %v5915_v18 }
 0x114   : > { %3956 = vmatprep.subr.bf16.mxu0 %v5159_v22 }
 0x116   : > { %3982 = vmatpush3.bf16.msk.msra.mxu1 %vm4443_vm11, %v5915_v18 }
 0x117   : > { %3958 = vmatpush3.bf16.msra.mxu0 %v5165_v12  ;;  %3984 = vmatprep.subr.msk.bf16.mxu1 %vm4453_vm5, %v5915_v18 }
 0x118   : > { %3960 = vmatprep.subr.bf16.mxu0 %v5179_v5 }
 0x11a   : > { %3986 = vmatpush3.bf16.msk.msra.mxu1 %vm4494_vm0, %v5915_v18 }
 0x11b   : > { %3962 = vmatpush3.bf16.msra.mxu0 %v6081_v14  ;;  %3988 = vmatprep.subr.msk.bf16.mxu1 %vm4518_vm7, %v5915_v18 }
 0x11c   : > { %3964 = vmatprep.subr.bf16.mxu0 %v6082_v32 }
 0x11e   : > { %3990 = vmatpush3.bf16.msk.msra.mxu1 %vm4556_vm8, %v5915_v18 }
 0x11f   : > { %3966 = vmatpush3.bf16.msra.mxu0 %v6083_v35  ;;  %3992 = vmatprep.subr.msk.bf16.mxu1 %vm4606_vm14, %v5915_v18 }
 0x120   : > { %3968 = vmatprep.subr.bf16.mxu0 %v5207_v39 }
 0x122   : > { %3994 = vmatpush3.bf16.msk.msra.mxu1 %vm4625_vm2, %v5915_v18 }
 0x123   : > { %3970 = vmatpush3.bf16.msra.mxu0 %v5328_v40  ;;  %3996 = vmatprep.subr.msk.bf16.mxu1 %vm4663_vm12, %v5915_v18 }
 0x124   : > { %3972 = vmatprep.subr.bf16.mxu0 %v5337_v62 }
 0x126   : > { %3998 = vmatpush3.bf16.msk.msra.mxu1 %vm5999_vm15, %v5915_v18 }
 0x127   : > { %3974 = vmatpush3.bf16.msra.mxu0 %v5354_v21  ;;  %4000 = vmatprep.subr.msk.bf16.mxu1 %vm6006_vm1, %v5915_v18 }
 0x12a   : > { %2524 = vmatmul.mubr.f32.vlgmr.msra.gmra.mrb[52].mxu0 %v5432_v31  ;;  %4002 = vmatpush3.bf16.msk.msra.mxu1 %vm6009_vm6, %v5915_v18 }
 0x12b   : > { %4004 = vmatprep.subr.msk.bf16.mxu1 %vm4776_vm3, %v5915_v18 }
 0x12e   : > { %4006 = vmatpush3.bf16.msk.msra.mxu1 %vm4800_vm13, %v5915_v18 }
 0x131   : > { %2628 = vmatmul.mubr.f32.vlgmr.msra.gmra.mrb[52].mxu1 %v5432_v31 }
 0x155   : > { %v3109_v46 = vpop.f32.mrb[0].mxu0 }
 0x156   : > { %v3110_v55 = vpop.f32.mrb[1].mxu0 }
 0x157   : > { %v3111_v0 = vadd.f32 %v3110_v55, %v3109_v46 }
 0x15e   : > { %v3112_v45 = vpop.f32.mrb[2].mxu0 }
 0x15f   : > { %v3113_v42 = vpop.f32.mrb[3].mxu0 }
 0x160   : > { %v3114_v20 = vadd.f32 %v3113_v42, %v3112_v45 }
 0x164   : > { %v3165_v52 = vpop.f32.mrb[0].mxu1  ;;  %v3115_v59 = vpop.f32.mrb[4].mxu0 }
 0x165   : > { %v3166_v2 = vpop.f32.mrb[1].mxu1  ;;  %v3116_v27 = vpop.f32.mrb[5].mxu0 }
 0x166   : > { %v3167_v29 = vadd.f32 %v3166_v2, %v3165_v52  ;;  %v3117_v22 = vadd.f32 %v3116_v27, %v3115_v59 }
 0x168   : > { %v942_v12 = vadd.f32 %v3167_v29, %v3111_v0  ;;  %v3168_v5 = vpop.f32.mrb[2].mxu1  ;;  %v3118_v39 = vpop.f32.mrb[6].mxu0 }
 0x169   : > { %v3169_v62 = vpop.f32.mrb[3].mxu1  ;;  %v3119_v18 = vpop.f32.mrb[7].mxu0 }
 0x16a   : > { %v3170_v53 = vadd.f32 %v3169_v62, %v3168_v5  ;;  %v3120_v8 = vadd.f32 %v3119_v18, %v3118_v39 }
 0x16c   : > { %v949_v15 = vadd.f32 %v3170_v53, %v3114_v20  ;;  %v3171_v3 = vpop.f32.mrb[4].mxu1  ;;  %v3121_v57 = vpop.f32.mrb[8].mxu0 }
 0x16d   : > { %v3172_v4 = vpop.f32.mrb[5].mxu1  ;;  %v3122_v63 = vpop.f32.mrb[9].mxu0 }
 0x16e   : > { %v3173_v19 = vadd.f32 %v3172_v4, %v3171_v3  ;;  %v3123_v54 = vadd.f32 %v3122_v63, %v3121_v57 }
 0x170   : > { %v956_v37 = vadd.f32 %v3173_v19, %v3117_v22  ;;  %v3174_v41 = vpop.f32.mrb[6].mxu1  ;;  %v3124_v60 = vpop.f32.mrb[10].mxu0 }
 0x171   : > { %v3175_v28 = vpop.f32.mrb[7].mxu1  ;;  %v3125_v21 = vpop.f32.mrb[11].mxu0 }
 0x172   : > { %v3176_v40 = vadd.f32 %v3175_v28, %v3174_v41  ;;  %v3126_v13 = vadd.f32 %v3125_v21, %v3124_v60 }
 0x174   : > { %v963_v31 = vadd.f32 %v3176_v40, %v3120_v8  ;;  %v3177_v58 = vpop.f32.mrb[8].mxu1  ;;  %v3127_v61 = vpop.f32.mrb[12].mxu0 }
 0x175   : > { %v3178_v43 = vpop.f32.mrb[9].mxu1  ;;  %v3128_v30 = vpop.f32.mrb[13].mxu0 }
 0x176   : > { %v3179_v6 = vadd.f32 %v3178_v43, %v3177_v58  ;;  %v3129_v11 = vadd.f32 %v3128_v30, %v3127_v61 }
 0x178   : > { %v970_v17 = vadd.f32 %v3179_v6, %v3123_v54  ;;  %v3180_v24 = vpop.f32.mrb[10].mxu1  ;;  %v3130_v16 = vpop.f32.mrb[14].mxu0 }
 0x179   : > { %v3181_v7 = vpop.f32.mrb[11].mxu1  ;;  %v3131_v23 = vpop.f32.mrb[15].mxu0 }
 0x17a   : > { %v3182_v9 = vadd.f32 %v3181_v7, %v3180_v24  ;;  %v3132_v10 = vadd.f32 %v3131_v23, %v3130_v16 }
 0x17c   : > { %v977_v51 = vadd.f32 %v3182_v9, %v3126_v13  ;;  %v3183_v26 = vpop.f32.mrb[12].mxu1  ;;  %v3221_v33 = vpop.f32.mrb[16].mxu0 }
 0x17d   : > { %v3184_v44 = vpop.f32.mrb[13].mxu1  ;;  %v3222_v25 = vpop.f32.mrb[17].mxu0 }
 0x17e   : > { %v3185_v49 = vadd.f32 %v3184_v44, %v3183_v26  ;;  %v3223_v50 = vadd.f32 %v3222_v25, %v3221_v33 }
 0x180   : > { %v984_v47 = vadd.f32 %v3185_v49, %v3129_v11  ;;  %v3186_v36 = vpop.f32.mrb[14].mxu1  ;;  %v1129_v48 = vadd.f32 %v3223_v50, %v942_v12  ;;  %v3224_v38 = vpop.f32.mrb[18].mxu0 }
 0x181   : > { %v3187_v1 = vpop.f32.mrb[15].mxu1  ;;  %v3225_v56 = vpop.f32.mrb[19].mxu0 }
 0x182   : > { %v3188_v34 = vadd.f32 %v3187_v1, %v3186_v36  ;;  %v3226_v14 = vadd.f32 %v3225_v56, %v3224_v38 }
 0x184   : > { %v991_v32 = vadd.f32 %v3188_v34, %v3132_v10  ;;  %v3277_v35 = vpop.f32.mrb[16].mxu1  ;;  %v1138_v46 = vadd.f32 %v3226_v14, %v949_v15  ;;  %v3227_v55 = vpop.f32.mrb[20].mxu0 }
 0x185   : > { %v3278_v0 = vpop.f32.mrb[17].mxu1  ;;  %v3228_v45 = vpop.f32.mrb[21].mxu0 }
 0x186   : > { %v3279_v42 = vadd.f32 %v3278_v0, %v3277_v35  ;;  %v3229_v20 = vadd.f32 %v3228_v45, %v3227_v55 }
 0x188   : > { %v1300_v52 = vadd.f32 %v3279_v42, %v1129_v48  ;;  %v3280_v2 = vpop.f32.mrb[18].mxu1  ;;  %v1147_v59 = vadd.f32 %v3229_v20, %v956_v37  ;;  %v3230_v29 = vpop.f32.mrb[22].mxu0 }
 0x189   : > { %v3281_v27 = vpop.f32.mrb[19].mxu1  ;;  %v3231_v22 = vpop.f32.mrb[23].mxu0 }
 0x18a   : > { %v3282_v12 = vadd.f32 %v3281_v27, %v3280_v2  ;;  %v3232_v5 = vadd.f32 %v3231_v22, %v3230_v29 }
 0x18c   : > { %v1311_v62 = vadd.f32 %v3282_v12, %v1138_v46  ;;  %v3283_v39 = vpop.f32.mrb[20].mxu1  ;;  %v1156_v53 = vadd.f32 %v3232_v5, %v963_v31  ;;  %v3233_v18 = vpop.f32.mrb[24].mxu0 }
 0x18d   : > { %v3284_v8 = vpop.f32.mrb[21].mxu1  ;;  %v3234_v3 = vpop.f32.mrb[25].mxu0 }
 0x18e   : > { %v3285_v15 = vadd.f32 %v3284_v8, %v3283_v39  ;;  %v3235_v4 = vadd.f32 %v3234_v3, %v3233_v18 }
 0x190   : > { %v1322_v57 = vadd.f32 %v3285_v15, %v1147_v59  ;;  %v3286_v19 = vpop.f32.mrb[22].mxu1  ;;  %v1165_v63 = vadd.f32 %v3235_v4, %v970_v17  ;;  %v3236_v54 = vpop.f32.mrb[26].mxu0 }
 0x191   : > { %v3287_v41 = vpop.f32.mrb[23].mxu1  ;;  %v3237_v28 = vpop.f32.mrb[27].mxu0 }
 0x192   : > { %v3288_v37 = vadd.f32 %v3287_v41, %v3286_v19  ;;  %v3238_v60 = vadd.f32 %v3237_v28, %v3236_v54 }
 0x194   : > { %v1333_v40 = vadd.f32 %v3288_v37, %v1156_v53  ;;  %v3289_v21 = vpop.f32.mrb[24].mxu1  ;;  %v1174_v13 = vadd.f32 %v3238_v60, %v977_v51  ;;  %v3239_v58 = vpop.f32.mrb[28].mxu0 }
 0x195   : > { %v3290_v43 = vpop.f32.mrb[25].mxu1  ;;  %v3240_v61 = vpop.f32.mrb[29].mxu0 }
 0x196   : > { %v3291_v31 = vadd.f32 %v3290_v43, %v3289_v21  ;;  %v3241_v6 = vadd.f32 %v3240_v61, %v3239_v58 }
 0x198   : > { %v1344_v30 = vadd.f32 %v3291_v31, %v1165_v63  ;;  %v3292_v11 = vpop.f32.mrb[26].mxu1  ;;  %v1183_v24 = vadd.f32 %v3241_v6, %v984_v47  ;;  %v3242_v16 = vpop.f32.mrb[30].mxu0 }
 0x199   : > { %v3293_v7 = vpop.f32.mrb[27].mxu1  ;;  %v3243_v23 = vpop.f32.mrb[31].mxu0 }
 0x19a   : > { %v3294_v17 = vadd.f32 %v3293_v7, %v3292_v11  ;;  %v3244_v9 = vadd.f32 %v3243_v23, %v3242_v16 }
 0x19c   : > { %v1355_v10 = vadd.f32 %v3294_v17, %v1174_v13  ;;  %v3295_v26 = vpop.f32.mrb[28].mxu1  ;;  %v1192_v33 = vadd.f32 %v3244_v9, %v991_v32  ;;  %v3333_v44 = vpop.f32.mrb[32].mxu0 }
 0x19d   : > { %v3296_v25 = vpop.f32.mrb[29].mxu1  ;;  %v3334_v51 = vpop.f32.mrb[33].mxu0 }
 0x19e   : > { %v3297_v49 = vadd.f32 %v3296_v25, %v3295_v26  ;;  %v3335_v50 = vadd.f32 %v3334_v51, %v3333_v44 }
 0x1a0   : > { %v1366_v36 = vadd.f32 %v3297_v49, %v1183_v24  ;;  %v3298_v48 = vpop.f32.mrb[30].mxu1  ;;  %v1545_v38 = vadd.f32 %v3335_v50, %v1300_v52  ;;  %v3336_v1 = vpop.f32.mrb[34].mxu0 }
 0x1a1   : > { %v3299_v56 = vpop.f32.mrb[31].mxu1  ;;  %v3337_v47 = vpop.f32.mrb[35].mxu0 }
 0x1a2   : > { %v3300_v34 = vadd.f32 %v3299_v56, %v3298_v48  ;;  %v3338_v14 = vadd.f32 %v3337_v47, %v3336_v1 }
 0x1a4   : > { %v1377_v35 = vadd.f32 %v3300_v34, %v1192_v33  ;;  %v3389_v46 = vpop.f32.mrb[32].mxu1  ;;  %v1552_v55 = vadd.f32 %v3338_v14, %v1311_v62  ;;  %v3339_v0 = vpop.f32.mrb[36].mxu0 }
 0x1a5   : > { %v3390_v32 = vpop.f32.mrb[33].mxu1  ;;  %v3340_v45 = vpop.f32.mrb[37].mxu0 }
 0x1a6   : > { %v3391_v42 = vadd.f32 %v3390_v32, %v3389_v46  ;;  %v3341_v20 = vadd.f32 %v3340_v45, %v3339_v0 }
 0x1a8   : > { %v1698_v2 = vadd.f32 %v3391_v42, %v1545_v38  ;;  %v3392_v59 = vpop.f32.mrb[34].mxu1  ;;  %v1559_v29 = vadd.f32 %v3341_v20, %v1322_v57  ;;  %v3342_v27 = vpop.f32.mrb[38].mxu0 }
 0x1a9   : > { %v3393_v22 = vpop.f32.mrb[35].mxu1  ;;  %v3343_v52 = vpop.f32.mrb[39].mxu0 }
 0x1aa   : > { %2646 = vst [vmem:[%s5639_s9] sm:$0xff] %v1698_v2  ;;  %v3394_v12 = vadd.f32 %v3393_v22, %v3392_v59  ;;  %v3344_v5 = vadd.f32 %v3343_v52, %v3342_v27 }
 0x1ac   : > { %v1705_v62 = vadd.f32 %v3394_v12, %v1552_v55  ;;  %v3395_v39 = vpop.f32.mrb[36].mxu1  ;;  %v1566_v53 = vadd.f32 %v3344_v5, %v1333_v40  ;;  %v3345_v18 = vpop.f32.mrb[40].mxu0 }
 0x1ad   : > { %v3396_v8 = vpop.f32.mrb[37].mxu1  ;;  %v3346_v3 = vpop.f32.mrb[41].mxu0 }
 0x1ae   : > { %2647 = vst [vmem:[%s5639_s9 + $0x8] sm:$0xff] %v1705_v62  ;;  %v3397_v15 = vadd.f32 %v3396_v8, %v3395_v39  ;;  %v3347_v4 = vadd.f32 %v3346_v3, %v3345_v18 }
 0x1b0   : > { %v1712_v57 = vadd.f32 %v3397_v15, %v1559_v29  ;;  %v3398_v19 = vpop.f32.mrb[38].mxu1  ;;  %v1573_v63 = vadd.f32 %v3347_v4, %v1344_v30  ;;  %v3348_v54 = vpop.f32.mrb[42].mxu0 }
 0x1b1   : > { %v3399_v41 = vpop.f32.mrb[39].mxu1  ;;  %v3349_v28 = vpop.f32.mrb[43].mxu0 }
 0x1b2   : > { %2648 = vst [vmem:[%s5639_s9 + $0x10] sm:$0xff] %v1712_v57  ;;  %v3400_v37 = vadd.f32 %v3399_v41, %v3398_v19  ;;  %v3350_v60 = vadd.f32 %v3349_v28, %v3348_v54 }
 0x1b4   : > { %v1719_v21 = vadd.f32 %v3400_v37, %v1566_v53  ;;  %v3401_v13 = vpop.f32.mrb[40].mxu1  ;;  %v1580_v40 = vadd.f32 %v3350_v60, %v1355_v10  ;;  %v3351_v58 = vpop.f32.mrb[44].mxu0 }
 0x1b5   : > { %v3402_v43 = vpop.f32.mrb[41].mxu1  ;;  %v3352_v61 = vpop.f32.mrb[45].mxu0 }
 0x1b6   : > { %2649 = vst [vmem:[%s5639_s9 + $0x18] sm:$0xff] %v1719_v21  ;;  %v3403_v31 = vadd.f32 %v3402_v43, %v3401_v13  ;;  %v3353_v6 = vadd.f32 %v3352_v61, %v3351_v58 }
 0x1b8   : > { %v1726_v11 = vadd.f32 %v3403_v31, %v1573_v63  ;;  %v3404_v24 = vpop.f32.mrb[42].mxu1  ;;  %v1587_v30 = vadd.f32 %v3353_v6, %v1366_v36  ;;  %v3354_v16 = vpop.f32.mrb[46].mxu0 }
 0x1b9   : > { %v3405_v7 = vpop.f32.mrb[43].mxu1  ;;  %v3355_v23 = vpop.f32.mrb[47].mxu0 }
 0x1ba   : > { %2650 = vst [vmem:[%s5639_s9 + $0x20] sm:$0xff] %v1726_v11  ;;  %v3406_v17 = vadd.f32 %v3405_v7, %v3404_v24  ;;  %v3356_v9 = vadd.f32 %v3355_v23, %v3354_v16 }
 0x1bc   : > { %v1733_v10 = vadd.f32 %v3406_v17, %v1580_v40  ;;  %v3407_v26 = vpop.f32.mrb[44].mxu1  ;;  %v1594_v33 = vadd.f32 %v3356_v9, %v1377_v35  ;;  %v3445_v25 = vpop.f32.mrb[48].mxu0 }
 0x1bd   : > { %v3408_v44 = vpop.f32.mrb[45].mxu1  ;;  %v3446_v49 = vpop.f32.mrb[49].mxu0 }
 0x1be   : > { %2651 = vst [vmem:[%s5639_s9 + $0x28] sm:$0xff] %v1733_v10  ;;  %v3409_v51 = vadd.f32 %v3408_v44, %v3407_v26  ;;  %v3447_v50 = vadd.f32 %v3446_v49, %v3445_v25 }
 0x1c0   : > { %v1740_v36 = vadd.f32 %v3409_v51, %v1587_v30  ;;  %v3410_v48 = vpop.f32.mrb[46].mxu1 }
 0x1c1   : > { %v3411_v38 = vpop.f32.mrb[47].mxu1 }
 0x1c2   : > { %2652 = vst [vmem:[%s5639_s9 + $0x30] sm:$0xff] %v1740_v36  ;;  %v3412_v1 = vadd.f32 %v3411_v38, %v3410_v48 }
 0x1c4   : > { %v1747_v56 = vadd.f32 %v3412_v1, %v1594_v33  ;;  %v3480_v47 = vpop.f32.mrb[48].mxu1 }
 0x1c5   : > { %v3481_v34 = vpop.f32.mrb[49].mxu1 }
 0x1c6   : > { %2653 = vst [vmem:[%s5639_s9 + $0x38] sm:$0xff] %v1747_v56  ;;  %v3482_v14 = vadd.f32 %v3481_v34, %v3480_v47 }
 0x1c7   : > { %4119 = shalt.err (!%p4116_p4)
}
 0x1c8   : > { %s4120_s6 = scalar_lea.hbm %s5655_s26, 1024  ;;  %s4124_s8 = scalar_lea.hbm %s5713_s4, 2048 }
 0x1c9   : > { %p4121_p7 = scmp.ne.s32.totalorder %s5655_s26, %s4120_s6  ;;  %p4125_p1 = scmp.lt.u32.totalorder %s5655_s26, %s5713_s4 }
 0x1ca   : > { %p4126_p3 = scmp.lt.u32.totalorder %s4124_s8, %s4120_s6  ;;  %p4128_p8 = scmp.lt.u32.totalorder %s4120_s6, %s5655_s26 }
 0x1cb   : > { %p4122_p10 = pnand %p4121_p7, %p6084_p11 }
 0x1cc   : > { %p4127_p9 = por %p4126_p3, %p4125_p1 }
 0x1cd   : > { %p4123_p12 = pneg %p4122_p10 }
 0x1ce   : > { %p4129_p0 = por %p4128_p8, %p4127_p9 }
 0x1d0   : > { %p4130_p6 = pnand %p4129_p0, %p4123_p12 }
 0x1d2   : > { %4133 = shalt.err (!%p4130_p6)
}
 0x1d3   : > { %s4196_s24 = smov 128   ;;  %s4197_s25 = smov 8   ;;  %v2112_v35 = vadd.f32 %v3482_v14, %v3447_v50  ;;  %v1766_v62 = vld [vmem:[#allocation2] sm:$0x7] }
 0x1d4   : > { %4009 = dma.vmem_to_hbm [thread:$0]  (%p6084_p11), %s5649_s11, 1024, %s5655_s26, %s2664_s12, %s4196_s24, %s4196_s24, %s4197_s25  }
 0x1d5   : > { %s2843_s28 = sshll.u32 %s4348_s10, 2 }
 0x1d6   : > { %s321_s26 = scalar_lea.vmem %s5712_s3, %s2843_s28 }
 0x1dd   : > { %v3515_v46 = vpop.f32.mrb[50].mxu0 }
 0x1de   : > { %v3516_v55 = vpop.f32.mrb[51].mxu0 }
 0x1df   : > { %v3517_v0 = vadd.f32 %v3516_v55, %v3515_v46 }
 0x1e1   : > { %v2250_v32 = vadd.f32 %v3517_v0, %v2112_v35 }
 0x1e4   : > { %v3550_v45 = vpop.f32.mrb[50].mxu1 }
 0x1e5   : > { %v3551_v42 = vpop.f32.mrb[51].mxu1 }
 0x1e6   : > { %v3552_v20 = vadd.f32 %v3551_v42, %v3550_v45 }
 0x1e8   : > { %v2358_v2 = vadd.f32 %v3552_v20, %v2250_v32 }
 0x1fd   : > { %v3585_v59 = vpop.f32.mrb[52].mxu0 }
 0x1fe   : > { %v3586_v29 = vpop.f32.mrb[53].mxu0 }
 0x1ff   : > { %v3587_v27 = vadd.f32 %v3586_v29, %v3585_v59 }
 0x201   : > { %v2526_v22 = vadd.f32 %v3587_v27, %v2358_v2 }
 0x204   : > { %v3620_v52 = vpop.f32.mrb[52].mxu1 }
 0x205   : > { %v3621_v12 = vpop.f32.mrb[53].mxu1 }
 0x206   : > { %v3622_v5 = vadd.f32 %v3621_v12, %v3620_v52 }
 0x208   : > { %v2630_v39 = vadd.f32 %v3622_v5, %v2526_v22 }
 0x20a   : > { %v2633_v53 = vadd.f32 %v2630_v39, %v1766_v62 }
 0x20c   : > { %2634 = vst [vmem:[#allocation2] sm:$0x7] %v2633_v53 }
 0x213   : > { %v2654_v18 = vld [vmem:[#allocation2] sm:$0x7] }
 0x214   : > { %2655 = vst [vmem:[%s321_s26] sm:$0x7] %v2654_v18 }
 0x215 PF: > { %s2706_s12 = sand.u32 1, %s4168_s15   ;;  %p6085_p11 = scmp.ne.s32.totalorder %s5857_s30, 0 }
 0x216   : > { %p6086_p13 = scmp.ge.s32.totalorder %s4188_s20, 2  ;;  %s2707_s18 = scalar_lea.sflag [#allocation6], %s2706_s12 }
 0x218   : > { %p4016_p2 = pnand %p6086_p13, %p6085_p11 }
 0x21a   : > { %4163 = dma.done.wait (!%p4016_p2), %s2707_s18, 1024  }
 0x21b   : > { %4165 = vsyncadd (!%p4016_p2), %s2707_s18, 4294966272  ;;  %s21_s20 = sadd.s32 1, %s4188_s20   ;;  %s6087_s15 = smov %s4172_s16 }
 0x21c   : > { %p18_p5 = scmp.ge.s32.totalorder %s21_s20, 4   ;;  %s6088_s16 = smov %s4176_s17 }
 0x21d   : > { %s6089_s17 = smov %s4279_s29  ;;  %s6090_s18 = smov %s4184_s19 }
 0x21e   : > { %s6091_s19 = smov %s6093_s23  ;;  %20 = sbr.rel (!%p18_p5) target bundleno = 6 (0x6), region = 103 }
 0x225   :  { %2712 = vsyncpa [#allocation5], 1 }
 0x226   :  { %2714 = vsyncpa [#allocation5 + $0x1], 1 }
 0x227   :  { %2715 = vsyncpa [#allocation6], 1 }
 0x228   :  { %2717 = vsyncpa [#allocation6 + $0x1], 1 }

</bundles_post_ra>
